<compile_context>
chip_gen: v7x
topology: tpu7x:2x2x1
jax: 0.10.0
libtpu: 0.0.40
codegen_flags: <defaults>
</compile_context>

<pallas_src>
import functools

import jax
import jax.numpy as jnp
from jax.experimental import pallas as pl
from jax.experimental.pallas import tpu as pltpu


def _round_up(x, m):
    return ((x + m - 1) // m) * m


def _choose_tb(B, S, D, x_itemsize, block_b):
    """Batch-tile size: VMEM-budget driven, multiple of 128, >=2 tiles if possible."""
    SD = S * D
    # Per-batch-row VMEM estimate: x double-buffered in its input dtype, plus
    # ~4 f32 [S*D]-wide temporaries (upcast x, weight, product, slack), plus
    # lane-padded mask/context tiles (double-buffered).
    per_row = (2 * SD * x_itemsize
               + 4 * SD * 4
               + 2 * 4 * (_round_up(S, 128) + _round_up(D, 128)))
    budget = 12 * 1024 * 1024
    tb = max(128, (budget // per_row) // 128 * 128)
    tb = min(tb, max(128, _round_up(block_b, 128)))
    # Keep >=2 grid tiles whenever B is big enough: v7x shards the "parallel"
    # grid axis across its 2 TensorCores.
    tb = min(tb, max(128, _round_up(pl.cdiv(B, 2), 128)))
    return tb


def set_decoder_kernel(x_ref, mask_ref, ctx_ref, out_ref, *, batch, tb, seq, dim):
    # Blocks: x [TB, S*D], mask [TB, S], ctx [TB, D], out [1, TB].
    x = x_ref[...].astype(jnp.float32)        # [TB, S*D]  (lane-dense)
    m = mask_ref[...].astype(jnp.float32)     # [TB, S]
    c = ctx_ref[...].astype(jnp.float32)      # [TB, D]

    m2 = m * m                                # reference applies the mask twice

    # weight[b, s*D + d] = m2[b, s] * c[b, d], built lane-dense: S lane
    # broadcasts of one mask column times ctx, glued with a single lane-axis
    # concatenate.  No lane-padded [TB, S, D] intermediate, no reshape.
    pieces = [jnp.broadcast_to(m2[:, s:s + 1], (tb, dim)) * c for s in range(seq)]
    w = jnp.concatenate(pieces, axis=1)       # [TB, S*D]

    # One dense elementwise multiply + one dense lane reduce (VPU + XLU).
    out_col = jnp.sum(x * w, axis=-1, keepdims=True)       # [TB, 1]

    # Tiny [TB,1] -> [1,TB] relayout so the store is a single lane-dense row.
    out_row = out_col.T                                     # [1, TB]

    # Neutralize rows past the true batch size (ragged last tile reads
    # undefined OOB data, so select -- don't rely on multiply-by-zero).
    gcol = jax.lax.broadcasted_iota(jnp.int32, (1, tb), 1) + pl.program_id(0) * tb
    out_row = jnp.where(gcol < batch, out_row, 0.0)

    out_ref[...] = out_row.astype(out_ref.dtype)


def set_decoder_forward(x, x_mask, context, block_b=1024):
    """Pallas implementation of SET_DECODER.forward (dropout = identity)."""
    B, S, D = x.shape
    assert x_mask.shape == (B, S)
    assert context.shape == (B, D)
    SD = S * D

    # Contiguous, zero-cost flatten of the trailing dims -> lane-dense tiles.
    x_flat = x.reshape(B, SD)

    TB = _choose_tb(B, S, D, x.dtype.itemsize, block_b)
    grid = pl.cdiv(B, TB)
    Bp = grid * TB

    kernel = functools.partial(set_decoder_kernel, batch=B, tb=TB, seq=S, dim=D)

    bytes_accessed = (x_flat.size * x_flat.dtype.itemsize
                      + x_mask.size * x_mask.dtype.itemsize
                      + context.size * context.dtype.itemsize
                      + Bp * x.dtype.itemsize)
    cost = pl.CostEstimate(flops=3 * B * SD, transcendentals=0,
                           bytes_accessed=bytes_accessed)

    out_row = pl.pallas_call(
        kernel,
        out_shape=jax.ShapeDtypeStruct((1, Bp), x.dtype),
        grid=(grid,),
        in_specs=[
            pl.BlockSpec((TB, SD), lambda b: (b, 0)),
            pl.BlockSpec((TB, S), lambda b: (b, 0)),
            pl.BlockSpec((TB, D), lambda b: (b, 0)),
        ],
        out_specs=pl.BlockSpec((1, TB), lambda b: (0, b)),
        compiler_params=pltpu.CompilerParams(
            dimension_semantics=("parallel",),
            vmem_limit_bytes=32 * 1024 * 1024),
        cost_estimate=cost,
    )(x_flat, x_mask, context)

    # Wrapper-side layout plumbing: (1, Bp) row slab -> (B, 1) column.
    return out_row.reshape(Bp, 1)[:B]


def init_params(key, dim_input, dim_output):
    """Deterministic init mirroring f_init_weight (uniform in [-0.1, 0.1]).

    NOTE: m_output_linear is never used in SET_DECODER.forward; parameters are
    created only to mirror the module's __init__.
    """
    initrange = 0.1
    kw, kb = jax.random.split(key)
    w = jax.random.uniform(kw, (dim_output, dim_input),
                           minval=-initrange, maxval=initrange,
                           dtype=jnp.float32)
    b = jax.random.uniform(kb, (dim_output,),
                           minval=-initrange, maxval=initrange,
                           dtype=jnp.float32)
    return {"m_output_linear.weight": w, "m_output_linear.bias": b}


def reference_forward(x, x_mask, context):
    # Plain-JAX reference matching the PyTorch forward (eval-mode dropout).
    xm = x * x_mask[:, :, None]
    attn = jnp.einsum("bsd,bd->bs", xm, context)
    return jnp.sum(attn * x_mask, axis=1, keepdims=True)


if __name__ == "__main__":
    key = jax.random.PRNGKey(0)
    k_x, k_mask, k_ctx, k_params = jax.random.split(key, 4)

    B, S, D = 2, 8, 32          # batch, set size, dim_input
    dim_output = 16             # unused-by-forward linear output dim

    _ = init_params(k_params, D, dim_output)  # deterministic param init

    x = jax.random.normal(k_x, (B, S, D), dtype=jnp.float32)
    x_mask = (jax.random.uniform(k_mask, (B, S)) > 0.3).astype(jnp.float32)
    context = jax.random.normal(k_ctx, (B, D), dtype=jnp.float32)

    out = jax.block_until_ready(set_decoder_forward(x, x_mask, context))
    ref = reference_forward(x, x_mask, context)
    assert out.shape == (B, 1)
    assert jnp.allclose(out, ref, atol=1e-4, rtol=1e-4)

    # Multi-tile grid + ragged last batch tile (no x padding anymore).
    B2 = 300
    k2x, k2m, k2c = jax.random.split(jax.random.PRNGKey(1), 3)
    x2 = jax.random.normal(k2x, (B2, S, D), dtype=jnp.float32)
    mask2 = (jax.random.uniform(k2m, (B2, S)) > 0.5).astype(jnp.float32)
    c2 = jax.random.normal(k2c, (B2, D), dtype=jnp.float32)
    out2 = jax.block_until_ready(set_decoder_forward(x2, mask2, c2, block_b=128))
    ref2 = reference_forward(x2, mask2, c2)
    assert out2.shape == (B2, 1)
    assert jnp.allclose(out2, ref2, atol=1e-3, rtol=1e-3)

    print("KERNEL_OK")
</pallas_src>

<mosaic_0001>
module attributes {stable_mosaic.version = 11 : i64} {
  func.func @set_decoder_kernel(%arg0: i32, %arg1: memref<128x256xf32, #tpu.memory_space<vmem>>, %arg2: memref<128x8xf32, #tpu.memory_space<vmem>>, %arg3: memref<128x32xf32, #tpu.memory_space<vmem>>, %arg4: memref<1x128xf32, #tpu.memory_space<vmem>>) attributes {dimension_semantics = [#tpu.dimension_semantics<parallel>], iteration_bounds = array<i64: 1>, scalar_prefetch = 0 : i64, scratch_operands = 0 : i64, tpu.core_type = #tpu.core_type<tc>, window_params = [{transform_indices = @transform_0, window_bounds = array<i64: 128, 256>}, {transform_indices = @transform_1, window_bounds = array<i64: 128, 8>}, {transform_indices = @transform_2, window_bounds = array<i64: 128, 32>}, {transform_indices = @transform_3, window_bounds = array<i64: 1, 128>}]} {
    %c0 = arith.constant 0 : index
    %c0_0 = arith.constant 0 : index
    %0 = vector.load %arg1[%c0, %c0_0] : memref<128x256xf32, #tpu.memory_space<vmem>>, vector<128x256xf32>
    %c0_1 = arith.constant 0 : index
    %c0_2 = arith.constant 0 : index
    %1 = vector.load %arg2[%c0_1, %c0_2] : memref<128x8xf32, #tpu.memory_space<vmem>>, vector<128x8xf32>
    %c0_3 = arith.constant 0 : index
    %c0_4 = arith.constant 0 : index
    %2 = vector.load %arg3[%c0_3, %c0_4] : memref<128x32xf32, #tpu.memory_space<vmem>>, vector<128x32xf32>
    %3 = arith.mulf %1, %1 : vector<128x8xf32>
    %4 = vector.extract_strided_slice %3 {offsets = [0, 0], sizes = [128, 1], strides = [1, 1]} : vector<128x8xf32> to vector<128x1xf32>
    %5 = vector.shape_cast %4 : vector<128x1xf32> to vector<128x1xf32>
    %6 = vector.broadcast %5 : vector<128x1xf32> to vector<128x32xf32>
    %7 = arith.mulf %6, %2 : vector<128x32xf32>
    %8 = vector.extract_strided_slice %3 {offsets = [0, 1], sizes = [128, 1], strides = [1, 1]} : vector<128x8xf32> to vector<128x1xf32>
    %9 = vector.shape_cast %8 : vector<128x1xf32> to vector<128x1xf32>
    %10 = vector.broadcast %9 : vector<128x1xf32> to vector<128x32xf32>
    %11 = arith.mulf %10, %2 : vector<128x32xf32>
    %12 = vector.extract_strided_slice %3 {offsets = [0, 2], sizes = [128, 1], strides = [1, 1]} : vector<128x8xf32> to vector<128x1xf32>
    %13 = vector.shape_cast %12 : vector<128x1xf32> to vector<128x1xf32>
    %14 = vector.broadcast %13 : vector<128x1xf32> to vector<128x32xf32>
    %15 = arith.mulf %14, %2 : vector<128x32xf32>
    %16 = vector.extract_strided_slice %3 {offsets = [0, 3], sizes = [128, 1], strides = [1, 1]} : vector<128x8xf32> to vector<128x1xf32>
    %17 = vector.shape_cast %16 : vector<128x1xf32> to vector<128x1xf32>
    %18 = vector.broadcast %17 : vector<128x1xf32> to vector<128x32xf32>
    %19 = arith.mulf %18, %2 : vector<128x32xf32>
    %20 = vector.extract_strided_slice %3 {offsets = [0, 4], sizes = [128, 1], strides = [1, 1]} : vector<128x8xf32> to vector<128x1xf32>
    %21 = vector.shape_cast %20 : vector<128x1xf32> to vector<128x1xf32>
    %22 = vector.broadcast %21 : vector<128x1xf32> to vector<128x32xf32>
    %23 = arith.mulf %22, %2 : vector<128x32xf32>
    %24 = vector.extract_strided_slice %3 {offsets = [0, 5], sizes = [128, 1], strides = [1, 1]} : vector<128x8xf32> to vector<128x1xf32>
    %25 = vector.shape_cast %24 : vector<128x1xf32> to vector<128x1xf32>
    %26 = vector.broadcast %25 : vector<128x1xf32> to vector<128x32xf32>
    %27 = arith.mulf %26, %2 : vector<128x32xf32>
    %28 = vector.extract_strided_slice %3 {offsets = [0, 6], sizes = [128, 1], strides = [1, 1]} : vector<128x8xf32> to vector<128x1xf32>
    %29 = vector.shape_cast %28 : vector<128x1xf32> to vector<128x1xf32>
    %30 = vector.broadcast %29 : vector<128x1xf32> to vector<128x32xf32>
    %31 = arith.mulf %30, %2 : vector<128x32xf32>
    %32 = vector.extract_strided_slice %3 {offsets = [0, 7], sizes = [128, 1], strides = [1, 1]} : vector<128x8xf32> to vector<128x1xf32>
    %33 = vector.shape_cast %32 : vector<128x1xf32> to vector<128x1xf32>
    %34 = vector.broadcast %33 : vector<128x1xf32> to vector<128x32xf32>
    %35 = arith.mulf %34, %2 : vector<128x32xf32>
    %36 = tpu.concatenate %7, %11, %15, %19, %23, %27, %31, %35 in 1 : vector<128x32xf32>, vector<128x32xf32>, vector<128x32xf32>, vector<128x32xf32>, vector<128x32xf32>, vector<128x32xf32>, vector<128x32xf32>, vector<128x32xf32> -> vector<128x256xf32>
    %37 = arith.mulf %0, %36 : vector<128x256xf32>
    %cst = arith.constant dense<0.000000e+00> : vector<128xf32>
    %38 = vector.multi_reduction <add>, %37, %cst [1] : vector<128x256xf32> to vector<128xf32>
    %39 = vector.shape_cast %38 : vector<128xf32> to vector<128x1xf32>
    %40 = tpu.transpose %39, [1, 0] : vector<128x1xf32> -> vector<1x128xf32>
    %41 = tpu.iota {dimensions = array<i32: 1>} : vector<1x128xi32>
    %c128_i32 = arith.constant 128 : i32
    %42 = arith.muli %arg0, %c128_i32 : i32
    %43 = vector.broadcast %42 : i32 to vector<1x128xi32>
    %44 = arith.addi %41, %43 : vector<1x128xi32>
    %c2_i32 = arith.constant 2 : i32
    %45 = vector.broadcast %c2_i32 : i32 to vector<1x128xi32>
    %46 = arith.cmpi slt, %44, %45 : vector<1x128xi32>
    %cst_5 = arith.constant 0.000000e+00 : f32
    %47 = vector.broadcast %cst_5 : f32 to vector<1x128xf32>
    %48 = arith.select %46, %40, %47 : vector<1x128xi1>, vector<1x128xf32>
    %c0_6 = arith.constant 0 : index
    %c0_7 = arith.constant 0 : index
    %49 = vector.load %arg4[%c0_6, %c0_7] : memref<1x128xf32, #tpu.memory_space<vmem>>, vector<1x128xf32>
    tpu.vector_store %arg4[%c0_6, %c0_7], %48 {strides = array<i32>} : memref<1x128xf32, #tpu.memory_space<vmem>>, vector<1x128xf32>,
    return
  }
  func.func @transform_0(%arg0: i32) -> (i32, i32) {
    %c0_i32 = arith.constant 0 : i32
    %c0_i32_0 = arith.constant 0 : i32
    return %arg0, %c0_i32 : i32, i32
  }
  func.func @transform_1(%arg0: i32) -> (i32, i32) {
    %c0_i32 = arith.constant 0 : i32
    %c0_i32_0 = arith.constant 0 : i32
    return %arg0, %c0_i32 : i32, i32
  }
  func.func @transform_2(%arg0: i32) -> (i32, i32) {
    %c0_i32 = arith.constant 0 : i32
    %c0_i32_0 = arith.constant 0 : i32
    return %arg0, %c0_i32 : i32, i32
  }
  func.func @transform_3(%arg0: i32) -> (i32, i32) {
    %c0_i32 = arith.constant 0 : i32
    %c0_i32_0 = arith.constant 0 : i32
    return %c0_i32, %arg0 : i32, i32
  }
}

</mosaic_0001>

<bundles_post_ra>
// kernel: tpu_custom_call.1
= control target key start
LH: loop header
LB: loop body
LE: loop exit
PB: predicated region body
PF: predicated region fallthrough
CT: control target
= control target key end

     0   :  { %8 = vsyncpa [#allocation3], 0  ;;  %s3501_s0 = inlined_call_operand.hbm [shape: f32[2,256], index: 0, kind: input, shape index: {}]   ;;  %s3502_s1 = inlined_call_operand.vmem [shape: f32[2,8], index: 1, kind: input, shape index: {}]   ;;  %s3503_s2 = inlined_call_operand.vmem [shape: f32[2,32], index: 2, kind: input, shape index: {}]   ;;  %s3504_s3 = inlined_call_operand.hbm [shape: f32[1,128], index: 3, kind: output, shape index: {}]  }
   0x1   :  { %9 = vsyncpa [#allocation4], 0 }
   0x2   :  { %14 = vsyncadd [#allocation3], 4032  ;;  %s2302_s12 = smov [#allocation2]   ;;  %s2254_s16 = scalar_lea.hbm %s3501_s0, 64 }
   0x3   :  { %s15_s13 = sshll.u32 %s2302_s12, 4  ;;  %p2255_p0 = scmp.ne.s32.totalorder %s3501_s0, %s2254_s16  ;;  %s16_s13 = int_to_ptr.vmem [resolvable:$true] %s15_s13 }
   0x4   :  { %p2258_p1 = scmp.lt.u32.totalorder %s2254_s16, %s3501_s0 }
   0x6   :  { %p2260_p2 = pnand %p2258_p1, %p2255_p0 }
   0x8   :  { %2263 = shalt.err (!%p2260_p2)
}
   0x9   :  { %s2264_s21 = scalar_lea.vmem %s16_s13, 64  ;;  %s2268_s22 = scalar_lea.vmem %s16_s13, 4096 }
   0xa   :  { %p2265_p3 = scmp.ne.s32.totalorder %s16_s13, %s2264_s21  ;;  %p2269_p4 = scmp.lt.s32.totalorder %s16_s13, %s16_s13 }
   0xb   :  { %p2270_p5 = scmp.lt.s32.totalorder %s2268_s22, %s2264_s21 }
   0xd   :  { %p2271_p6 = por %p2270_p5, %p2269_p4 }
   0xf   :  { %p2272_p7 = pnand %p2271_p6, %p2265_p3 }
  0x11   :  { %2275 = shalt.err (!%p2272_p7)
}
  0x12   :  { %s2303_s23 = smov 64   ;;  %s2304_s24 = smov 4  }
  0x13   :  { %21 = dma.hbm_to_vmem [thread:$0]  %s3501_s0, 64, %s16_s13, [#allocation3], %s2303_s23, %s2303_s23, %s2304_s24  }
  0x14   :  { %2298 = dma.done.wait [#allocation3], 4096  }
  0x15   :  { %2299 = vsyncadd [#allocation3], 4294963200  ;;  %v2305_v0 = vmov 0   ;;  %v95_v1 = vld [vmem:[%s3502_s1 + $0x10] sm:$0xff]  ;;  %v93_v2 = vld [vmem:[%s3502_s1] sm:$0xff]  ;;  %v2306_v33 = vmov 1  }
  0x16   :  { %2231 = vset.pattern.permute.xlu1 %v2305_v0  ;;  %2230 = vset.pattern.permute.xlu0 %v2305_v0  ;;  %v96_v3 = vld [vmem:[%s3502_s1 + $0x18] sm:$0xff]  ;;  %v2360_v4 = vmul.f32 %v95_v1, %v95_v1  ;;  %v2362_v5 = vmul.f32 %v93_v2, %v93_v2  ;;  %v94_v6 = vld [vmem:[%s3502_s1 + $0x8] sm:$0xff]  ;;  %v97_v10 = vld [vmem:[%s3502_s1 + $0x20] sm:$0xff]  ;;  %v2307_v34 = vmov 2   ;;  %v2308_v35 = vmov 3   ;;  %s2313_s0 = smov 32  }
  0x17   :  { %v2369_v7 = vmul.f32 %v96_v3, %v96_v3  ;;  %v2371_v8 = vmul.f32 %v94_v6, %v94_v6  ;;  %v98_v9 = vld [vmem:[%s3502_s1 + $0x28] sm:$0xff]  ;;  %v2383_v12 = vmul.f32 %v97_v10, %v97_v10  ;;  %v100_v13 = vld [vmem:[%s3502_s1 + $0x38] sm:$0xff]  ;;  %v99_v14 = vld [vmem:[%s3502_s1 + $0x30] sm:$0xff]  ;;  %v2309_v37 = vmov 4   ;;  %s2314_s9 = smov 96  }
  0x18   :  { %153 = vperm.xlu1 %2231, %v2360_v4   ;;  %143 = vperm.xlu0 %2230, %v2362_v5   ;;  %v2381_v11 = vmul.f32 %v98_v9, %v98_v9  ;;  %v2393_v15 = vmul.f32 %v100_v13, %v100_v13  ;;  %v2395_v16 = vmul.f32 %v99_v14, %v99_v14  ;;  %v102_v17 = vld [vmem:[%s3502_s1 + $0x48] sm:$0xff]  ;;  %v101_v18 = vld [vmem:[%s3502_s1 + $0x40] sm:$0xff]  ;;  %v104_v21 = vld [vmem:[%s3502_s1 + $0x58] sm:$0xff]  ;;  %v2310_v53 = vmov 5  }
  0x19   :  { %v2405_v19 = vmul.f32 %v102_v17, %v102_v17  ;;  %v2407_v20 = vmul.f32 %v101_v18, %v101_v18  ;;  %v103_v22 = vld [vmem:[%s3502_s1 + $0x50] sm:$0xff]  ;;  %v2417_v23 = vmul.f32 %v104_v21, %v104_v21  ;;  %v106_v25 = vld [vmem:[%s3502_s1 + $0x68] sm:$0xff]  ;;  %v105_v26 = vld [vmem:[%s3502_s1 + $0x60] sm:$0xff]  ;;  %v2311_v10 = vmov 6  }
  0x1a   :  { %v2419_v24 = vmul.f32 %v103_v22, %v103_v22  ;;  %v2429_v27 = vmul.f32 %v106_v25, %v106_v25  ;;  %v2431_v28 = vmul.f32 %v105_v26, %v105_v26  ;;  %v108_v29 = vld [vmem:[%s3502_s1 + $0x78] sm:$0xff]  ;;  %v107_v30 = vld [vmem:[%s3502_s1 + $0x70] sm:$0xff]  ;;  %vm1181_vm0 = vcmask 261120  }
  0x1b   :  { %v2441_v31 = vmul.f32 %v108_v29, %v108_v29  ;;  %v2443_v32 = vmul.f32 %v107_v30, %v107_v30  ;;  %vm1198_vm1 = vcmask 523264   ;;  %vm1215_vm2 = vcmask 785408  }
  0x1c   :  { %158 = vperm.xlu1 %2231, %v2369_v7   ;;  %148 = vperm.xlu0 %2230, %v2371_v8  }
  0x20   :  { %168 = vperm.xlu1 %2231, %v2381_v11   ;;  %163 = vperm.xlu0 %2230, %v2383_v12  }
  0x24   :  { %178 = vperm.xlu1 %2231, %v2393_v15   ;;  %173 = vperm.xlu0 %2230, %v2395_v16  }
  0x28   :  { %188 = vperm.xlu1 %2231, %v2405_v19   ;;  %183 = vperm.xlu0 %2230, %v2407_v20  }
  0x2c   :  { %198 = vperm.xlu1 %2231, %v2417_v23   ;;  %193 = vperm.xlu0 %2230, %v2419_v24  }
  0x30   :  { %208 = vperm.xlu1 %2231, %v2429_v27   ;;  %203 = vperm.xlu0 %2230, %v2431_v28  }
  0x34   :  { %218 = vperm.xlu1 %2231, %v2441_v31   ;;  %213 = vperm.xlu0 %2230, %v2443_v32  }
  0x38   :  { %2233 = vset.pattern.permute.xlu1 %v2306_v33  ;;  %2232 = vset.pattern.permute.xlu0 %v2306_v33 }
  0x39   :  { %242 = vperm.xlu1 %2233, %v2371_v8   ;;  %238 = vperm.xlu0 %2232, %v2362_v5  }
  0x3d   :  { %246 = vperm.xlu1 %2233, %v2360_v4   ;;  %250 = vperm.xlu0 %2232, %v2369_v7  }
  0x41   :  { %254 = vperm.xlu1 %2233, %v2383_v12   ;;  %258 = vperm.xlu0 %2232, %v2381_v11  }
  0x45   :  { %262 = vperm.xlu1 %2233, %v2395_v16   ;;  %266 = vperm.xlu0 %2232, %v2393_v15  }
  0x49   :  { %270 = vperm.xlu1 %2233, %v2407_v20   ;;  %274 = vperm.xlu0 %2232, %v2405_v19  }
  0x4d   :  { %278 = vperm.xlu1 %2233, %v2419_v24   ;;  %282 = vperm.xlu0 %2232, %v2417_v23  }
  0x51   :  { %286 = vperm.xlu1 %2233, %v2431_v28   ;;  %290 = vperm.xlu0 %2232, %v2429_v27  }
  0x55   :  { %294 = vperm.xlu1 %2233, %v2443_v32   ;;  %298 = vperm.xlu0 %2232, %v2441_v31  }
  0x59   :  { %2234 = vset.pattern.permute.xlu1 %v2307_v34  ;;  %2235 = vset.pattern.permute.xlu0 %v2307_v34 }
  0x5a   :  { %318 = vperm.xlu1 %2234, %v2362_v5   ;;  %322 = vperm.xlu0 %2235, %v2371_v8  }
  0x5e   :  { %326 = vperm.xlu1 %2234, %v2360_v4   ;;  %334 = vperm.xlu0 %2235, %v2383_v12  }
  0x62   :  { %330 = vperm.xlu1 %2234, %v2369_v7   ;;  %342 = vperm.xlu0 %2235, %v2395_v16  }
  0x66   :  { %338 = vperm.xlu1 %2234, %v2381_v11   ;;  %350 = vperm.xlu0 %2235, %v2407_v20  }
  0x6a   :  { %346 = vperm.xlu1 %2234, %v2393_v15   ;;  %358 = vperm.xlu0 %2235, %v2419_v24  }
  0x6e   :  { %354 = vperm.xlu1 %2234, %v2405_v19   ;;  %366 = vperm.xlu0 %2235, %v2431_v28  }
  0x72   :  { %362 = vperm.xlu1 %2234, %v2417_v23   ;;  %374 = vperm.xlu0 %2235, %v2443_v32  }
  0x76   :  { %370 = vperm.xlu1 %2234, %v2429_v27   ;;  %2236 = vset.pattern.permute.xlu0 %v2308_v35 }
  0x77   :  { %398 = vperm.xlu0 %2236, %v2362_v5  }
  0x7a   :  { %378 = vperm.xlu1 %2234, %v2441_v31  }
  0x7b   :  { %410 = vperm.xlu0 %2236, %v2369_v7  }
  0x7e   :  { %2237 = vset.pattern.permute.xlu1 %v2308_v35 }
  0x7f   :  { %402 = vperm.xlu1 %2237, %v2371_v8   ;;  %418 = vperm.xlu0 %2236, %v2381_v11  }
  0x83   :  { %406 = vperm.xlu1 %2237, %v2360_v4   ;;  %426 = vperm.xlu0 %2236, %v2393_v15  }
  0x87   :  { %414 = vperm.xlu1 %2237, %v2383_v12   ;;  %434 = vperm.xlu0 %2236, %v2405_v19  }
  0x8b   :  { %422 = vperm.xlu1 %2237, %v2395_v16   ;;  %442 = vperm.xlu0 %2236, %v2417_v23  }
  0x8f   :  { %430 = vperm.xlu1 %2237, %v2407_v20   ;;  %450 = vperm.xlu0 %2236, %v2429_v27  }
  0x93   :  { %438 = vperm.xlu1 %2237, %v2419_v24   ;;  %458 = vperm.xlu0 %2236, %v2441_v31  }
  0x97   :  { %v2493_v36 = vpop.permute.xlu1 %153  ;;  %446 = vperm.xlu1 %2237, %v2431_v28   ;;  %2239 = vset.pattern.permute.xlu0 %v2309_v37  ;;  %v2496_v38 = vpop.permute.xlu0 %143 }
  0x98   :  { %3510 = vst [vmem:[#allocation8_spill] sm:$0xff] %v2493_v36  ;;  %3511 = vst [vmem:[#allocation9_spill] sm:$0xff] %v2496_v38  ;;  %482 = vperm.xlu0 %2239, %v2371_v8  }
  0x9b   :  { %v2499_v39 = vpop.permute.xlu1 %158  ;;  %454 = vperm.xlu1 %2237, %v2443_v32   ;;  %v2502_v40 = vpop.permute.xlu0 %148 }
  0x9c   :  { %3512 = vst [vmem:[#allocation10_spill] sm:$0xff] %v2499_v39  ;;  %3513 = vst [vmem:[#allocation11_spill] sm:$0xff] %v2502_v40  ;;  %494 = vperm.xlu0 %2239, %v2383_v12  }
  0x9f   :  { %v2505_v41 = vpop.permute.xlu1 %168  ;;  %2238 = vset.pattern.permute.xlu1 %v2309_v37  ;;  %v2507_v42 = vpop.permute.xlu0 %163 }
  0xa0   :  { %3514 = vst [vmem:[#allocation12_spill] sm:$0xff] %v2505_v41  ;;  %3515 = vst [vmem:[#allocation13_spill] sm:$0xff] %v2507_v42  ;;  %478 = vperm.xlu1 %2238, %v2362_v5   ;;  %502 = vperm.xlu0 %2239, %v2395_v16  }
  0xa3   :  { %v2511_v43 = vpop.permute.xlu1 %178  ;;  %v2513_v44 = vpop.permute.xlu0 %173 }
  0xa4   :  { %3516 = vst [vmem:[#allocation14_spill] sm:$0xff] %v2511_v43  ;;  %3517 = vst [vmem:[#allocation15_spill] sm:$0xff] %v2513_v44  ;;  %486 = vperm.xlu1 %2238, %v2360_v4   ;;  %510 = vperm.xlu0 %2239, %v2407_v20  }
  0xa7   :  { %v2517_v45 = vpop.permute.xlu1 %188  ;;  %v2519_v46 = vpop.permute.xlu0 %183 }
  0xa8   :  { %3518 = vst [vmem:[#allocation16_spill] sm:$0xff] %v2517_v45  ;;  %3519 = vst [vmem:[#allocation17_spill] sm:$0xff] %v2519_v46  ;;  %490 = vperm.xlu1 %2238, %v2369_v7   ;;  %518 = vperm.xlu0 %2239, %v2419_v24  }
  0xab   :  { %v2523_v47 = vpop.permute.xlu1 %198  ;;  %v2525_v48 = vpop.permute.xlu0 %193 }
  0xac   :  { %3520 = vst [vmem:[#allocation18_spill] sm:$0xff] %v2523_v47  ;;  %3521 = vst [vmem:[#allocation19_spill] sm:$0xff] %v2525_v48  ;;  %498 = vperm.xlu1 %2238, %v2381_v11   ;;  %526 = vperm.xlu0 %2239, %v2431_v28  }
  0xaf   :  { %v2529_v49 = vpop.permute.xlu1 %208  ;;  %v2531_v50 = vpop.permute.xlu0 %203 }
  0xb0   :  { %3522 = vst [vmem:[#allocation20_spill] sm:$0xff] %v2529_v49  ;;  %3523 = vst [vmem:[#allocation21_spill] sm:$0xff] %v2531_v50  ;;  %506 = vperm.xlu1 %2238, %v2393_v15   ;;  %534 = vperm.xlu0 %2239, %v2443_v32  }
  0xb3   :  { %v2535_v51 = vpop.permute.xlu1 %218  ;;  %v2537_v52 = vpop.permute.xlu0 %213 }
  0xb4   :  { %3524 = vst [vmem:[#allocation22_spill] sm:$0xff] %v2535_v51  ;;  %514 = vperm.xlu1 %2238, %v2405_v19   ;;  %2240 = vset.pattern.permute.xlu0 %v2310_v53 }
  0xb5   :  { %558 = vperm.xlu0 %2240, %v2362_v5  }
  0xb8   :  { %v2541_v54 = vpop.permute.xlu1 %242  ;;  %522 = vperm.xlu1 %2238, %v2417_v23   ;;  %v2544_v55 = vpop.permute.xlu0 %238 }
  0xb9   :  { %570 = vperm.xlu0 %2240, %v2369_v7  }
  0xbc   :  { %v2547_v56 = vpop.permute.xlu1 %246  ;;  %530 = vperm.xlu1 %2238, %v2429_v27   ;;  %v2550_v57 = vpop.permute.xlu0 %250 }
  0xbd   :  { %578 = vperm.xlu0 %2240, %v2381_v11  }
  0xc0   :  { %v2553_v58 = vpop.permute.xlu1 %254  ;;  %538 = vperm.xlu1 %2238, %v2441_v31   ;;  %v2556_v59 = vpop.permute.xlu0 %258 }
  0xc1   :  { %586 = vperm.xlu0 %2240, %v2393_v15  }
  0xc4   :  { %v2559_v60 = vpop.permute.xlu1 %262  ;;  %2241 = vset.pattern.permute.xlu1 %v2310_v53  ;;  %v2561_v61 = vpop.permute.xlu0 %266  ;;  %v2312_v53 = vmov 7  }
  0xc5   :  { %562 = vperm.xlu1 %2241, %v2371_v8   ;;  %594 = vperm.xlu0 %2240, %v2405_v19  }
  0xc8   :  { %v2565_v62 = vpop.permute.xlu1 %270  ;;  %v2567_v63 = vpop.permute.xlu0 %274 }
  0xc9   :  { %566 = vperm.xlu1 %2241, %v2360_v4   ;;  %602 = vperm.xlu0 %2240, %v2417_v23  }
  0xcc   :  { %v2571_v0 = vpop.permute.xlu1 %278  ;;  %v2573_v1 = vpop.permute.xlu0 %282 }
  0xcd   :  { %574 = vperm.xlu1 %2241, %v2383_v12   ;;  %610 = vperm.xlu0 %2240, %v2429_v27  }
  0xd0   :  { %v2577_v2 = vpop.permute.xlu1 %286  ;;  %v2579_v3 = vpop.permute.xlu0 %290 }
  0xd1   :  { %582 = vperm.xlu1 %2241, %v2395_v16   ;;  %618 = vperm.xlu0 %2240, %v2441_v31  }
  0xd4   :  { %v2583_v6 = vpop.permute.xlu1 %294  ;;  %v2585_v9 = vpop.permute.xlu0 %298 }
  0xd5   :  { %590 = vperm.xlu1 %2241, %v2407_v20   ;;  %2243 = vset.pattern.permute.xlu0 %v2311_v10 }
  0xd6   :  { %642 = vperm.xlu0 %2243, %v2371_v8  }
  0xd9   :  { %598 = vperm.xlu1 %2241, %v2419_v24   ;;  %v2590_v13 = vpop.permute.xlu1 %318  ;;  %v2592_v14 = vpop.permute.xlu0 %322 }
  0xda   :  { %654 = vperm.xlu0 %2243, %v2383_v12  }
  0xdd   :  { %606 = vperm.xlu1 %2241, %v2431_v28   ;;  %v2596_v17 = vpop.permute.xlu1 %326  ;;  %v2598_v18 = vpop.permute.xlu0 %334 }
  0xde   :  { %662 = vperm.xlu0 %2243, %v2395_v16  }
  0xe1   :  { %614 = vperm.xlu1 %2241, %v2443_v32   ;;  %v2602_v21 = vpop.permute.xlu1 %330  ;;  %v2604_v22 = vpop.permute.xlu0 %342 }
  0xe2   :  { %670 = vperm.xlu0 %2243, %v2407_v20  }
  0xe5   :  { %2242 = vset.pattern.permute.xlu1 %v2311_v10  ;;  %v2607_v25 = vpop.permute.xlu1 %338  ;;  %v2609_v26 = vpop.permute.xlu0 %350 }
  0xe6   :  { %638 = vperm.xlu1 %2242, %v2362_v5   ;;  %678 = vperm.xlu0 %2243, %v2419_v24  }
  0xe9   :  { %v2613_v29 = vpop.permute.xlu1 %346  ;;  %v2615_v30 = vpop.permute.xlu0 %358 }
  0xea   :  { %646 = vperm.xlu1 %2242, %v2360_v4   ;;  %686 = vperm.xlu0 %2243, %v2431_v28  }
  0xed   :  { %v2619_v33 = vpop.permute.xlu1 %354  ;;  %v2621_v34 = vpop.permute.xlu0 %366 }
  0xee   :  { %650 = vperm.xlu1 %2242, %v2369_v7   ;;  %694 = vperm.xlu0 %2243, %v2443_v32  }
  0xf1   :  { %v2625_v35 = vpop.permute.xlu1 %362  ;;  %v2627_v37 = vpop.permute.xlu0 %374 }
  0xf2   :  { %658 = vperm.xlu1 %2242, %v2381_v11   ;;  %2244 = vset.pattern.permute.xlu0 %v2312_v53 }
  0xf3   :  { %718 = vperm.xlu0 %2244, %v2362_v5  }
  0xf5   :  { %v2631_v10 = vpop.permute.xlu1 %370 }
  0xf6   :  { %666 = vperm.xlu1 %2242, %v2393_v15   ;;  %v2634_v51 = vpop.permute.xlu0 %398 }
  0xf7   :  { %730 = vperm.xlu0 %2244, %v2369_v7  }
  0xf9   :  { %v2637_v49 = vpop.permute.xlu1 %378 }
  0xfa   :  { %674 = vperm.xlu1 %2242, %v2405_v19   ;;  %v2640_v50 = vpop.permute.xlu0 %410 }
  0xfb   :  { %738 = vperm.xlu0 %2244, %v2381_v11  }
  0xfe   :  { %682 = vperm.xlu1 %2242, %v2417_v23   ;;  %v2644_v47 = vpop.permute.xlu1 %402  ;;  %v2646_v5 = vpop.permute.xlu0 %418 }
  0xff   :  { %746 = vperm.xlu0 %2244, %v2393_v15  }
 0x102   :  { %690 = vperm.xlu1 %2242, %v2429_v27   ;;  %v2650_v48 = vpop.permute.xlu1 %406  ;;  %v2652_v7 = vpop.permute.xlu0 %426 }
 0x103   :  { %754 = vperm.xlu0 %2244, %v2405_v19  }
 0x106   :  { %698 = vperm.xlu1 %2242, %v2441_v31   ;;  %v2656_v45 = vpop.permute.xlu1 %414  ;;  %v2658_v11 = vpop.permute.xlu0 %434 }
 0x107   :  { %762 = vperm.xlu0 %2244, %v2417_v23   ;;  %v2676_v23 = vld [vmem:[%s3503_s2 + $0x8] sm:$0xff] }
 0x108   :  { %3525 = vst [vmem:[#allocation23_spill] sm:$0xff] %v2676_v23 }
 0x10a   :  { %2245 = vset.pattern.permute.xlu1 %v2312_v53  ;;  %v2661_v46 = vpop.permute.xlu1 %422  ;;  %v2663_v15 = vpop.permute.xlu0 %442  ;;  %v302_v53 = vmul.f32 %v2541_v54, %v2676_v23 }
 0x10b   :  { %722 = vperm.xlu1 %2245, %v2371_v8   ;;  %770 = vperm.xlu0 %2244, %v2429_v27  }
 0x10e   :  { %v2667_v43 = vpop.permute.xlu1 %430  ;;  %v2669_v19 = vpop.permute.xlu0 %450 }
 0x10f   :  { %726 = vperm.xlu1 %2245, %v2360_v4   ;;  %778 = vperm.xlu0 %2244, %v2441_v31   ;;  %v2689_v4 = vld [vmem:[%s3503_s2 + $0x18] sm:$0xff] }
 0x110   :  { %v304_v27 = vmul.f32 %v2550_v57, %v2689_v4 }
 0x112   :  { %v2680_v44 = vpop.permute.xlu1 %438  ;;  %v2682_v8 = vpop.permute.xlu0 %458 }
 0x113   :  { %3526 = vst [vmem:[#allocation24_spill] sm:$0xff] %v2682_v8  ;;  %734 = vperm.xlu1 %2245, %v2383_v12   ;;  %815 = vrot.lane.b32.xlu0 %v302_v53, %s2313_s0  ;;  %v2702_v12 = vld [vmem:[%s3503_s2 + $0x28] sm:$0xff] }
 0x114   :  { %v306_v53 = vmul.f32 %v2556_v59, %v2702_v12 }
 0x116   :  { %v2693_v31 = vpop.permute.xlu1 %446 }
 0x117   :  { %742 = vperm.xlu1 %2245, %v2395_v16   ;;  %819 = vrot.lane.b32.xlu0 %v304_v27, %s2313_s0  ;;  %v2697_v54 = vpop.permute.xlu0 %482  ;;  %v2715_v16 = vld [vmem:[%s3503_s2 + $0x38] sm:$0xff] }
 0x118   :  { %3527 = vst [vmem:[#allocation25_spill] sm:$0xff] %v2697_v54  ;;  %v308_v27 = vmul.f32 %v2561_v61, %v2715_v16  ;;  %v2741_v61 = vld [vmem:[%s3503_s2 + $0x58] sm:$0xff] }
 0x11a   :  { %v2706_v41 = vpop.permute.xlu1 %454 }
 0x11b   :  { %750 = vperm.xlu1 %2245, %v2407_v20   ;;  %823 = vrot.lane.b32.xlu0 %v306_v53, %s2313_s0  ;;  %v2710_v57 = vpop.permute.xlu0 %494  ;;  %v2728_v20 = vld [vmem:[%s3503_s2 + $0x48] sm:$0xff] }
 0x11c   :  { %3528 = vst [vmem:[#allocation26_spill] sm:$0xff] %v2710_v57  ;;  %v310_v53 = vmul.f32 %v2567_v63, %v2728_v20  ;;  %v2754_v63 = vld [vmem:[%s3503_s2] sm:$0xff] }
 0x11d   :  { %3535 = vst [vmem:[#allocation33_spill] sm:$0xff] %v2754_v63 }
 0x11f   :  { %758 = vperm.xlu1 %2245, %v2419_v24   ;;  %v2720_v54 = vpop.permute.xlu1 %478  ;;  %827 = vrot.lane.b32.xlu0 %v308_v27, %s2313_s0  ;;  %v2723_v59 = vpop.permute.xlu0 %502  ;;  %v312_v27 = vmul.f32 %v2573_v1, %v2741_v61  ;;  %v301_v1 = vmul.f32 %v2544_v55, %v2754_v63  ;;  %v2779_v55 = vld [vmem:[%s3503_s2 + $0x78] sm:$0xff] }
 0x120   :  { %3529 = vst [vmem:[#allocation27_spill] sm:$0xff] %v2720_v54  ;;  %3530 = vst [vmem:[#allocation28_spill] sm:$0xff] %v2723_v59 }
 0x123   :  { %766 = vperm.xlu1 %2245, %v2431_v28   ;;  %v2733_v57 = vpop.permute.xlu1 %486  ;;  %831 = vrot.lane.b32.xlu0 %v310_v53, %s2313_s0  ;;  %v2736_v24 = vpop.permute.xlu0 %510  ;;  %v2759_v53 = vld [vmem:[%s3503_s2 + $0x68] sm:$0xff] }
 0x124   :  { %3531 = vst [vmem:[#allocation29_spill] sm:$0xff] %v2733_v57  ;;  %3532 = vst [vmem:[#allocation30_spill] sm:$0xff] %v2736_v24 }
 0x127   :  { %774 = vperm.xlu1 %2245, %v2443_v32   ;;  %v2746_v59 = vpop.permute.xlu1 %490  ;;  %835 = vrot.lane.b32.xlu0 %v312_v27, %s2313_s0  ;;  %v2749_v28 = vpop.permute.xlu0 %518  ;;  %v314_v32 = vmul.f32 %v2579_v3, %v2759_v53 }
 0x128   :  { %3533 = vst [vmem:[#allocation31_spill] sm:$0xff] %v2746_v59  ;;  %3534 = vst [vmem:[#allocation32_spill] sm:$0xff] %v2749_v28  ;;  %v2774_v28 = vld [vmem:[%s3503_s2 + $0x10] sm:$0xff] }
 0x129   :  { %v303_v3 = vmul.f32 %v2547_v56, %v2774_v28  ;;  %v382_v56 = vmul.f32 %v2592_v14, %v2676_v23 }
 0x12b   :  { %v2765_v24 = vpop.permute.xlu1 %498  ;;  %813 = vrot.lane.b32.xlu1 %v301_v1, %s2313_s0  ;;  %839 = vrot.lane.b32.xlu0 %v314_v32, %s2313_s0  ;;  %v2769_v27 = vpop.permute.xlu0 %526  ;;  %v316_v1 = vmul.f32 %v2585_v9, %v2779_v55 }
 0x12c   :  { %3536 = vst [vmem:[#allocation34_spill] sm:$0xff] %v2765_v24  ;;  %3537 = vst [vmem:[#allocation35_spill] sm:$0xff] %v2769_v27  ;;  %v2794_v27 = vld [vmem:[%s3503_s2 + $0x20] sm:$0xff] }
 0x12d   :  { %v305_v59 = vmul.f32 %v2553_v58, %v2794_v27  ;;  %v384_v58 = vmul.f32 %v2602_v21, %v2689_v4 }
 0x12f   :  { %v2785_v24 = vpop.permute.xlu1 %506  ;;  %817 = vrot.lane.b32.xlu1 %v303_v3, %s2313_s0  ;;  %843 = vrot.lane.b32.xlu0 %v316_v1, %s2313_s0  ;;  %v2789_v32 = vpop.permute.xlu0 %534  ;;  %v2807_v3 = vld [vmem:[%s3503_s2 + $0x30] sm:$0xff] }
 0x130   :  { %3538 = vst [vmem:[#allocation36_spill] sm:$0xff] %v2785_v24  ;;  %3539 = vst [vmem:[#allocation37_spill] sm:$0xff] %v2789_v32  ;;  %v307_v32 = vmul.f32 %v2559_v60, %v2807_v3  ;;  %v386_v60 = vmul.f32 %v2607_v25, %v2702_v12  ;;  %v394_v24 = vmul.f32 %v2631_v10, %v2759_v53 }
 0x133   :  { %v2800_v9 = vpop.permute.xlu1 %514  ;;  %821 = vrot.lane.b32.xlu1 %v305_v59, %s2313_s0  ;;  %879 = vrot.lane.b32.xlu0 %v382_v56, %s2303_s23  ;;  %v2822_v59 = vld [vmem:[%s3503_s2 + $0x40] sm:$0xff] }
 0x134   :  { %3540 = vst [vmem:[#allocation38_spill] sm:$0xff] %v2800_v9  ;;  %v2809_v1 = vpop.permute.xlu0 %558  ;;  %v309_v9 = vmul.f32 %v2565_v62, %v2822_v59  ;;  %v388_v62 = vmul.f32 %v2613_v29, %v2715_v16  ;;  %v2865_v29 = vld [vmem:[%s3503_s2 + $0x70] sm:$0xff] }
 0x137   :  { %v2815_v14 = vpop.permute.xlu1 %522  ;;  %825 = vrot.lane.b32.xlu1 %v307_v32, %s2313_s0  ;;  %883 = vrot.lane.b32.xlu0 %v384_v58, %s2303_s23  ;;  %v2837_v32 = vld [vmem:[%s3503_s2 + $0x50] sm:$0xff] }
 0x138   :  { %3541 = vst [vmem:[#allocation39_spill] sm:$0xff] %v2815_v14  ;;  %v2824_v56 = vpop.permute.xlu0 %570  ;;  %v311_v14 = vmul.f32 %v2571_v0, %v2837_v32  ;;  %v390_v0 = vmul.f32 %v2619_v33, %v2728_v20 }
 0x13b   :  { %v2830_v21 = vpop.permute.xlu1 %530  ;;  %829 = vrot.lane.b32.xlu1 %v309_v9, %s2313_s0  ;;  %887 = vrot.lane.b32.xlu0 %v386_v60, %s2303_s23  ;;  %v2852_v9 = vld [vmem:[%s3503_s2 + $0x60] sm:$0xff] }
 0x13c   :  { %3542 = vst [vmem:[#allocation40_spill] sm:$0xff] %v2830_v21  ;;  %v2839_v58 = vpop.permute.xlu0 %578  ;;  %v313_v21 = vmul.f32 %v2577_v2, %v2852_v9  ;;  %v392_v2 = vmul.f32 %v2625_v35, %v2741_v61 }
 0x13f   :  { %v2845_v25 = vpop.permute.xlu1 %538  ;;  %833 = vrot.lane.b32.xlu1 %v311_v14, %s2313_s0  ;;  %891 = vrot.lane.b32.xlu0 %v388_v62, %s2303_s23 }
 0x140   :  { %3543 = vst [vmem:[#allocation41_spill] sm:$0xff] %v2845_v25  ;;  %v2854_v60 = vpop.permute.xlu0 %586  ;;  %v315_v25 = vmul.f32 %v2583_v6, %v2865_v29 }
 0x143   :  { %837 = vrot.lane.b32.xlu1 %v313_v21, %s2313_s0  ;;  %895 = vrot.lane.b32.xlu0 %v390_v0, %s2303_s23  ;;  %v381_v0 = vmul.f32 %v2590_v13, %v2754_v63 }
 0x144   :  { %v2867_v14 = vpop.permute.xlu1 %562  ;;  %v2869_v62 = vpop.permute.xlu0 %594 }
 0x147   :  { %841 = vrot.lane.b32.xlu1 %v315_v25, %s2313_s0  ;;  %899 = vrot.lane.b32.xlu0 %v392_v2, %s2303_s23  ;;  %v383_v25 = vmul.f32 %v2596_v17, %v2774_v28  ;;  %v396_v2 = vmul.f32 %v2637_v49, %v2779_v55  ;;  %v387_v17 = vmul.f32 %v2604_v22, %v2807_v3 }
 0x148   :  { %v567_v33 = vpop.permute.xlu1 %566  ;;  %v2877_v21 = vpop.permute.xlu0 %602  ;;  %v391_v22 = vmul.f32 %v2615_v30, %v2837_v32 }
 0x149   :  { %v623_v36 = vmul.f32 %v567_v33, %v2774_v28 }
 0x14b   :  { %877 = vrot.lane.b32.xlu1 %v381_v0, %s2303_s23  ;;  %903 = vrot.lane.b32.xlu0 %v394_v24, %s2303_s23  ;;  %v385_v24 = vmul.f32 %v2598_v18, %v2794_v27  ;;  %v462_v0 = vmul.f32 %v2644_v47, %v2676_v23  ;;  %v389_v47 = vmul.f32 %v2609_v26, %v2822_v59 }
 0x14c   :  { %v2885_v6 = vpop.permute.xlu1 %574  ;;  %v2887_v35 = vpop.permute.xlu0 %610  ;;  %v393_v26 = vmul.f32 %v2621_v34, %v2852_v9 }
 0x14f   :  { %881 = vrot.lane.b32.xlu1 %v383_v25, %s2303_s23  ;;  %907 = vrot.lane.b32.xlu0 %v396_v2, %s2303_s23  ;;  %v464_v25 = vmul.f32 %v2640_v50, %v2689_v4 }
 0x150   :  { %v2895_v13 = vpop.permute.xlu1 %582  ;;  %v2897_v10 = vpop.permute.xlu0 %618 }
 0x153   :  { %885 = vrot.lane.b32.xlu1 %v385_v24, %s2303_s23  ;;  %943 = vrot.lane.b32.xlu0 %v462_v0, %s2314_s9  ;;  %v466_v24 = vmul.f32 %v2646_v5, %v2702_v12 }
 0x154   :  { %v2905_v49 = vpop.permute.xlu1 %590 }
 0x155   :  { %v643_v2 = vpop.permute.xlu0 %642 }
 0x157   :  { %889 = vrot.lane.b32.xlu1 %v387_v17, %s2303_s23  ;;  %947 = vrot.lane.b32.xlu0 %v464_v25, %s2314_s9 }
 0x158   :  { %v2913_v18 = vpop.permute.xlu1 %598 }
 0x159   :  { %v2919_v0 = vpop.permute.xlu0 %654 }
 0x15b   :  { %893 = vrot.lane.b32.xlu1 %v389_v47, %s2303_s23  ;;  %951 = vrot.lane.b32.xlu0 %v466_v24, %s2314_s9  ;;  %v395_v47 = vmul.f32 %v2627_v37, %v2865_v29  ;;  %v463_v37 = vmul.f32 %v2650_v48, %v2774_v28 }
 0x15c   :  { %v2923_v50 = vpop.permute.xlu1 %606 }
 0x15d   :  { %v2927_v17 = vpop.permute.xlu0 %662 }
 0x15f   :  { %897 = vrot.lane.b32.xlu1 %v391_v22, %s2303_s23  ;;  %v461_v22 = vmul.f32 %v2634_v51, %v2754_v63 }
 0x160   :  { %v2930_v25 = vpop.permute.xlu1 %614 }
 0x161   :  { %v2934_v5 = vpop.permute.xlu0 %670 }
 0x163   :  { %901 = vrot.lane.b32.xlu1 %v393_v26, %s2303_s23 }
 0x165   :  { %v639_v24 = vpop.permute.xlu1 %638  ;;  %v2939_v57 = vpop.permute.xlu0 %678 }
 0x166   :  { %v701_v30 = vmul.f32 %v639_v24, %v2754_v63 }
 0x167   :  { %905 = vrot.lane.b32.xlu1 %v395_v47, %s2303_s23  ;;  %v465_v47 = vmul.f32 %v2656_v45, %v2794_v27  ;;  %v622_v45 = vmul.f32 %v2867_v14, %v2676_v23 }
 0x168   :  { %1069 = vrot.lane.b32.xlu0 %v701_v30, %s2303_s23 }
 0x169   :  { %v647_v34 = vpop.permute.xlu1 %646  ;;  %v2946_v42 = vpop.permute.xlu0 %686 }
 0x16b   :  { %941 = vrot.lane.b32.xlu1 %v461_v22, %s2314_s9  ;;  %v621_v22 = vmul.f32 %v2809_v1, %v2754_v63  ;;  %v702_v1 = vmul.f32 %v643_v2, %v2676_v23 }
 0x16d   :  { %v651_v26 = vpop.permute.xlu1 %650  ;;  %v2951_v39 = vpop.permute.xlu0 %694 }
 0x16f   :  { %945 = vrot.lane.b32.xlu1 %v463_v37, %s2314_s9 }
 0x171   :  { %v659_v24 = vpop.permute.xlu1 %658 }
 0x172   :  { %v719_v30 = vpop.permute.xlu0 %718 }
 0x173   :  { %v781_v51 = vmul.f32 %v719_v30, %v2754_v63  ;;  %949 = vrot.lane.b32.xlu1 %v465_v47, %s2314_s9  ;;  %v703_v30 = vmul.f32 %v647_v34, %v2774_v28 }
 0x175   :  { %v2960_v40 = vpop.permute.xlu1 %666  ;;  %1133 = vrot.lane.b32.xlu0 %v781_v51, %s2314_s9 }
 0x176   :  { %v731_v48 = vpop.permute.xlu0 %730 }
 0x177   :  { %1005 = vrot.lane.b32.xlu1 %v621_v22, %s2313_s0 }
 0x179   :  { %v2967_v37 = vpop.permute.xlu1 %674  ;;  %1009 = vrot.lane.b32.xlu0 %v623_v36, %s2313_s0 }
 0x17a   :  { %v739_v47 = vpop.permute.xlu0 %738 }
 0x17b   :  { %1007 = vrot.lane.b32.xlu1 %v622_v45, %s2313_s0 }
 0x17d   :  { %v2973_v51 = vpop.permute.xlu1 %682  ;;  %1073 = vrot.lane.b32.xlu0 %v703_v30, %s2303_s23 }
 0x17e   :  { %v2976_v33 = vpop.permute.xlu0 %746 }
 0x17f   :  { %1071 = vrot.lane.b32.xlu1 %v702_v1, %s2303_s23  ;;  %v624_v1 = vmul.f32 %v2824_v56, %v2689_v4 }
 0x181   :  { %v2979_v14 = vpop.permute.xlu1 %690 }
 0x182   :  { %v2981_v22 = vpop.permute.xlu0 %754 }
 0x185   :  { %v2983_v36 = vpop.permute.xlu1 %698 }
 0x186   :  { %3544 = vst [vmem:[#allocation42_spill] sm:$0xff] %v2983_v36  ;;  %v2985_v54 = vpop.permute.xlu0 %762 }
 0x18a   :  { %v723_v34 = vpop.permute.xlu1 %722  ;;  %v2987_v45 = vpop.permute.xlu0 %770 }
 0x18b   :  { %v782_v2 = vmul.f32 %v723_v34, %v2676_v23  ;;  %v625_v34 = vmul.f32 %v2885_v6, %v2794_v27 }
 0x18d   :  { %1135 = vrot.lane.b32.xlu1 %v782_v2, %s2314_s9  ;;  %v704_v2 = vmul.f32 %v651_v26, %v2689_v4  ;;  %v626_v26 = vmul.f32 %v2839_v58, %v2702_v12 }
 0x18e   :  { %v727_v30 = vpop.permute.xlu1 %726  ;;  %v2991_v38 = vpop.permute.xlu0 %778 }
 0x18f   :  { %v783_v63 = vmul.f32 %v727_v30, %v2774_v28  ;;  %v705_v30 = vmul.f32 %v2919_v0, %v2794_v27 }
 0x191   :  { %1011 = vrot.lane.b32.xlu1 %v624_v1, %s2313_s0  ;;  %1137 = vrot.lane.b32.xlu0 %v783_v63, %s2314_s9  ;;  %v784_v63 = vmul.f32 %v731_v48, %v2689_v4  ;;  %v627_v48 = vmul.f32 %v2895_v13, %v2807_v3 }
 0x192   :  { %v735_v8 = vpop.permute.xlu1 %734  ;;  %v2998_v36 = vpop.permute.xlu0 %815 }
 0x195   :  { %1075 = vrot.lane.b32.xlu1 %v704_v2, %s2303_s23  ;;  %1013 = vrot.lane.b32.xlu0 %v625_v34, %s2313_s0  ;;  %v785_v34 = vmul.f32 %v735_v8, %v2794_v27 }
 0x196   :  { %v743_v23 = vpop.permute.xlu1 %742  ;;  %v3005_v56 = vpop.permute.xlu0 %819 }
 0x199   :  { %1077 = vrot.lane.b32.xlu0 %v705_v30, %s2303_s23  ;;  %1139 = vrot.lane.b32.xlu1 %v784_v63, %s2314_s9  ;;  %v706_v30 = vmul.f32 %v659_v24, %v2702_v12  ;;  %v707_v63 = vmul.f32 %v2927_v17, %v2807_v3 }
 0x19a   :  { %v751_v1 = vpop.permute.xlu1 %750  ;;  %v3012_v6 = vpop.permute.xlu0 %823 }
 0x19d   :  { %1141 = vrot.lane.b32.xlu0 %v785_v34, %s2314_s9  ;;  %1015 = vrot.lane.b32.xlu1 %v626_v26, %s2313_s0  ;;  %v786_v26 = vmul.f32 %v739_v47, %v2702_v12  ;;  %v467_v34 = vmul.f32 %v2661_v46, %v2807_v3 }
 0x19e   :  { %v3019_v2 = vpop.permute.xlu1 %758  ;;  %v3021_v0 = vpop.permute.xlu0 %827 }
 0x1a1   :  { %1017 = vrot.lane.b32.xlu0 %v627_v48, %s2313_s0  ;;  %1079 = vrot.lane.b32.xlu1 %v706_v30, %s2303_s23  ;;  %v628_v48 = vmul.f32 %v2854_v60, %v2715_v16  ;;  %v708_v30 = vmul.f32 %v2960_v40, %v2715_v16 }
 0x1a2   :  { %v3028_v58 = vpop.permute.xlu1 %766  ;;  %v3030_v8 = vpop.permute.xlu0 %831 }
 0x1a5   :  { %1081 = vrot.lane.b32.xlu0 %v707_v63, %s2303_s23  ;;  %1143 = vrot.lane.b32.xlu1 %v786_v26, %s2314_s9  ;;  %v787_v63 = vmul.f32 %v743_v23, %v2807_v3  ;;  %v468_v26 = vmul.f32 %v2652_v7, %v2715_v16 }
 0x1a6   :  { %v3037_v13 = vpop.permute.xlu1 %774  ;;  %v3039_v24 = vpop.permute.xlu0 %835 }
 0x1a9   :  { %1019 = vrot.lane.b32.xlu0 %v628_v48, %s2313_s0  ;;  %953 = vrot.lane.b32.xlu1 %v467_v34, %s2314_s9  ;;  %v629_v34 = vmul.f32 %v2905_v49, %v2822_v59  ;;  %v709_v48 = vmul.f32 %v2934_v5, %v2822_v59 }
 0x1aa   :  { %v3047_v17 = vpop.permute.xlu1 %813  ;;  %v3049_v47 = vpop.permute.xlu0 %839 }
 0x1ad   :  { %1083 = vrot.lane.b32.xlu0 %v708_v30, %s2303_s23  ;;  %1145 = vrot.lane.b32.xlu1 %v787_v63, %s2314_s9  ;;  %v788_v30 = vmul.f32 %v2976_v33, %v2715_v16  ;;  %v469_v63 = vmul.f32 %v2667_v43, %v2822_v59  ;;  %v710_v33 = vmul.f32 %v2967_v37, %v2728_v20 }
 0x1ae   :  { %v3056_v46 = vpop.permute.xlu1 %817  ;;  %v3058_v60 = vpop.permute.xlu0 %843 }
 0x1af   :  { %3545 = vst [vmem:[#allocation43_spill] sm:$0xff] %v3058_v60  ;;  %v31_v60 = vld [vmem:[#allocation2 + $0x8] sm:$0xf] }
 0x1b1   :  { %1021 = vrot.lane.b32.xlu0 %v629_v34, %s2313_s0  ;;  %955 = vrot.lane.b32.xlu1 %v468_v26, %s2314_s9  ;;  %v630_v26 = vmul.f32 %v2869_v62, %v2728_v20  ;;  %v789_v34 = vmul.f32 %v751_v1, %v2822_v59  ;;  %v470_v62 = vmul.f32 %v2658_v11, %v2728_v20 }
 0x1b2   :  { %v3066_v40 = vpop.permute.xlu1 %821  ;;  %v3068_v23 = vpop.permute.xlu0 %879  ;;  %v711_v1 = vmul.f32 %v2939_v57, %v2837_v32 }
 0x1b5   :  { %1085 = vrot.lane.b32.xlu0 %v709_v48, %s2303_s23  ;;  %1147 = vrot.lane.b32.xlu1 %v788_v30, %s2314_s9  ;;  %v631_v48 = vmul.f32 %v2913_v18, %v2837_v32  ;;  %v471_v18 = vmul.f32 %v2680_v44, %v2837_v32 }
 0x1b6   :  { %v3076_v7 = vpop.permute.xlu1 %825  ;;  %v3078_v49 = vpop.permute.xlu0 %883 }
 0x1b9   :  { %1023 = vrot.lane.b32.xlu0 %v630_v26, %s2313_s0  ;;  %957 = vrot.lane.b32.xlu1 %v469_v63, %s2314_s9  ;;  %v790_v63 = vmul.f32 %v2981_v22, %v2728_v20  ;;  %v712_v20 = vmul.f32 %v2973_v51, %v2741_v61  ;;  %v791_v22 = vmul.f32 %v3019_v2, %v2837_v32 }
 0x1ba   :  { %v3086_v5 = vpop.permute.xlu1 %829  ;;  %v3088_v16 = vpop.permute.xlu0 %887  ;;  %v713_v51 = vmul.f32 %v2946_v42, %v2852_v9  ;;  %v792_v2 = vmul.f32 %v2985_v54, %v2741_v61  ;;  %v714_v54 = vmul.f32 %v2979_v14, %v2759_v53 }
 0x1bd   :  { %1087 = vrot.lane.b32.xlu0 %v710_v33, %s2303_s23  ;;  %1149 = vrot.lane.b32.xlu1 %v789_v34, %s2314_s9  ;;  %v632_v33 = vmul.f32 %v2877_v21, %v2741_v61  ;;  %v472_v21 = vmul.f32 %v2663_v15, %v2741_v61  ;;  %v793_v61 = vmul.f32 %v3028_v58, %v2852_v9 }
 0x1be   :  { %v3095_v43 = vpop.permute.xlu1 %833  ;;  %v3101_v30 = vpop.permute.xlu0 %891  ;;  %v794_v58 = vmul.f32 %v2987_v45, %v2759_v53 }
 0x1c1   :  { %1025 = vrot.lane.b32.xlu0 %v631_v48, %s2313_s0  ;;  %959 = vrot.lane.b32.xlu1 %v470_v62, %s2314_s9  ;;  %v633_v62 = vmul.f32 %v2923_v50, %v2852_v9  ;;  %v473_v50 = vmul.f32 %v2693_v31, %v2852_v9  ;;  %v715_v9 = vmul.f32 %v2951_v39, %v2865_v29 }
 0x1c2   :  { %v3105_v37 = vpop.permute.xlu1 %837  ;;  %v3111_v26 = vpop.permute.xlu0 %895  ;;  %v475_v39 = vmul.f32 %v2706_v41, %v2865_v29 }
 0x1c5   :  { %1089 = vrot.lane.b32.xlu0 %v711_v1, %s2303_s23  ;;  %1151 = vrot.lane.b32.xlu1 %v790_v63, %s2314_s9  ;;  %v634_v1 = vmul.f32 %v2887_v35, %v2759_v53  ;;  %v474_v35 = vmul.f32 %v2669_v19, %v2759_v53  ;;  %v235_v19 = vmul.f32 %v2537_v52, %v2865_v29 }
 0x1c6   :  { %v842_v11 = vpop.permute.xlu1 %841  ;;  %v3127_v34 = vpop.permute.xlu0 %899  ;;  %v636_v53 = vmul.f32 %v2897_v10, %v2779_v55  ;;  %v3550_v10 = vld [vmem:[#allocation24_spill] sm:$0xff] }
 0x1c9   :  { %1027 = vrot.lane.b32.xlu0 %v632_v33, %s2313_s0  ;;  %961 = vrot.lane.b32.xlu1 %v471_v18, %s2314_s9  ;;  %v635_v33 = vmul.f32 %v2930_v25, %v2865_v29  ;;  %v1196_v25 = vsel %vm1181_vm0, %v235_v19, %v842_v11  ;;  %v3552_v19 = vld [vmem:[#allocation9_spill] sm:$0xff] }
 0x1ca   :  { %v3121_v57 = vpop.permute.xlu1 %877  ;;  %v3137_v48 = vpop.permute.xlu0 %903 }
 0x1cb   :  { %3546 = vst [vmem:[#allocation44_spill] sm:$0xff] %v3137_v48 }
 0x1cd   :  { %1091 = vrot.lane.b32.xlu0 %v712_v20, %s2303_s23  ;;  %1153 = vrot.lane.b32.xlu1 %v791_v22, %s2314_s9 }
 0x1ce   :  { %v3131_v44 = vpop.permute.xlu1 %881  ;;  %v3155_v63 = vpop.permute.xlu0 %907 }
 0x1cf   :  { %3547 = vst [vmem:[#allocation45_spill] sm:$0xff] %v3155_v63 }
 0x1d1   :  { %1029 = vrot.lane.b32.xlu0 %v633_v62, %s2313_s0  ;;  %963 = vrot.lane.b32.xlu1 %v472_v21, %s2314_s9  ;;  %v3549_v62 = vld [vmem:[#allocation42_spill] sm:$0xff] }
 0x1d2   :  { %v3141_v32 = vpop.permute.xlu1 %885  ;;  %v3165_v18 = vpop.permute.xlu0 %943  ;;  %v716_v11 = vmul.f32 %v3549_v62, %v2779_v55 }
 0x1d5   :  { %1093 = vrot.lane.b32.xlu0 %v713_v51, %s2303_s23  ;;  %1155 = vrot.lane.b32.xlu1 %v792_v2, %s2314_s9  ;;  %v795_v51 = vmul.f32 %v3037_v13, %v2865_v29  ;;  %v476_v2 = vmul.f32 %v3550_v10, %v2779_v55 }
 0x1d6   :  { %v3149_v15 = vpop.permute.xlu1 %889  ;;  %v3183_v20 = vpop.permute.xlu0 %947 }
 0x1d9   :  { %1031 = vrot.lane.b32.xlu0 %v634_v1, %s2313_s0  ;;  %965 = vrot.lane.b32.xlu1 %v473_v50, %s2314_s9  ;;  %v796_v50 = vmul.f32 %v2991_v38, %v2779_v55 }
 0x1da   :  { %v3159_v42 = vpop.permute.xlu1 %893  ;;  %v3197_v21 = vpop.permute.xlu0 %951 }
 0x1dd   :  { %1095 = vrot.lane.b32.xlu0 %v714_v54, %s2303_s23  ;;  %1157 = vrot.lane.b32.xlu1 %v793_v61, %s2314_s9  ;;  %v2315_v54 = vmov 1983009808  }
 0x1de   :  { %v3169_v31 = vpop.permute.xlu1 %897  ;;  %v1070_v1 = vpop.permute.xlu0 %1069  ;;  %v1315_v61 = vunpack.c.l.s4 %v2315_v54 }
 0x1e1   :  { %1033 = vrot.lane.b32.xlu0 %v635_v33, %s2313_s0  ;;  %967 = vrot.lane.b32.xlu1 %v474_v35, %s2314_s9  ;;  %v3509_v35 = vlaneseq  ;;  %v1316_v33 = vunpack.c.0.s8 %v1315_v61 }
 0x1e2   :  { %v3177_v14 = vpop.permute.xlu1 %901 }
 0x1e5   :  { %1097 = vrot.lane.b32.xlu0 %v715_v9, %s2303_s23  ;;  %1159 = vrot.lane.b32.xlu1 %v794_v58, %s2314_s9  ;;  %v1318_v9 = vshrl.u32 %v3509_v35, 7  ;;  %v3551_v58 = vld [vmem:[#allocation33_spill] sm:$0xff] }
 0x1e6   :  { %v906_v22 = vpop.permute.xlu1 %905 }
 0x1e7   :  { %v3195_v45 = vsel %vm1198_vm1, %v1196_v25, %v906_v22  ;;  %v1134_v13 = vpop.permute.xlu0 %1133  ;;  %v221_v25 = vmul.f32 %v3552_v19, %v3551_v58  ;;  %v3553_v22 = vld [vmem:[#allocation27_spill] sm:$0xff] }
 0x1e8   :  { %3548 = vst [vmem:[#allocation46_spill] sm:$0xff] %v3195_v45  ;;  %v541_v38 = vmul.f32 %v3553_v22, %v3551_v58  ;;  %v3555_v22 = vld [vmem:[#allocation23_spill] sm:$0xff] }
 0x1e9   :  { %1035 = vrot.lane.b32.xlu0 %v636_v53, %s2313_s0  ;;  %969 = vrot.lane.b32.xlu1 %v475_v39, %s2314_s9  ;;  %v1182_v39 = vsel %vm1181_vm0, %v221_v25, %v3047_v17  ;;  %v3554_v25 = vld [vmem:[#allocation8_spill] sm:$0xff] }
 0x1ea   :  { %v942_v52 = vpop.permute.xlu1 %941  ;;  %v1199_v62 = vsel %vm1198_vm1, %v1182_v39, %v3121_v57  ;;  %v223_v57 = vmul.f32 %v3554_v25, %v2774_v28  ;;  %v32_v39 = vld [vmem:[#allocation2 + $0xc] sm:$0xf]  ;;  %v29_v45 = vld [vmem:[#allocation2] sm:$0xf] }
 0x1eb   :  { %v1216_v10 = vsel %vm1215_vm2, %v1199_v62, %v942_v52  ;;  %v30_v52 = vld [vmem:[#allocation2 + $0x4] sm:$0xf]  ;;  %v3558_v62 = vld [vmem:[#allocation13_spill] sm:$0xff] }
 0x1ed   :  { %1099 = vrot.lane.b32.xlu0 %v716_v11, %s2303_s23  ;;  %1161 = vrot.lane.b32.xlu1 %v795_v51, %s2314_s9  ;;  %v3225_v11 = vsub.s32 %v1316_v33, %v1318_v9  ;;  %v3556_v33 = vld [vmem:[#allocation11_spill] sm:$0xff] }
 0x1ee   :  { %v946_v41 = vpop.permute.xlu1 %945  ;;  %v222_v9 = vmul.f32 %v3556_v33, %v3555_v22  ;;  %v3561_v33 = vld [vmem:[#allocation29_spill] sm:$0xff] }
 0x1ef   :  { %v543_v35 = vmul.f32 %v3561_v33, %v2774_v28 }
 0x1f0   :  { %v1183_v63 = vsel %vm1181_vm0, %v222_v9, %v2998_v36 }
 0x1f1   :  { %971 = vrot.lane.b32.xlu1 %v476_v2, %s2314_s9  ;;  %1163 = vrot.lane.b32.xlu0 %v796_v50, %s2314_s9  ;;  %v1010_v2 = vpop.permute.xlu0 %1009 }
 0x1f2   :  { %v3213_v29 = vpop.permute.xlu1 %949  ;;  %v1234_v36 = vsel %vm1181_vm0, %v543_v35, %v1010_v2  ;;  %v3562_v2 = vld [vmem:[#allocation31_spill] sm:$0xff] }
 0x1f6   :  { %v1006_v55 = vpop.permute.xlu1 %1005 }
 0x1f7   :  { %v1232_v53 = vsel %vm1181_vm0, %v541_v38, %v1006_v55 }
 0x1f8   :  { %v1248_v51 = vsel %vm1198_vm1, %v1232_v53, %v1070_v1 }
 0x1f9   :  { %v1264_v50 = vsel %vm1215_vm2, %v1248_v51, %v1134_v13  ;;  %v3557_v13 = vld [vmem:[#allocation10_spill] sm:$0xff]  ;;  %v225_v51 = vmul.f32 %v3558_v62, %v2794_v27  ;;  %v1200_v62 = vsel %vm1198_vm1, %v1183_v63, %v3068_v23 }
 0x1fa   :  { %v1312_v54 = vcombine.low %v1216_v10, %v1264_v50  ;;  %v1313_v61 = vcombine.high %v1216_v10, %v1264_v50  ;;  %v1008_v58 = vpop.permute.xlu1 %1007  ;;  %v224_v53 = vmul.f32 %v3557_v13, %v2689_v4  ;;  %v3559_v10 = vld [vmem:[#allocation25_spill] sm:$0xff]  ;;  %v1184_v13 = vsel %vm1181_vm0, %v223_v57, %v3056_v46 }
 0x1fb   :  { %v542_v50 = vmul.f32 %v3559_v10, %v3555_v22  ;;  %v1217_v28 = vsel %vm1215_vm2, %v1200_v62, %v3165_v18  ;;  %v36_v62 = vld [vmem:[#allocation2 + $0x1c] sm:$0xf] }
 0x1fc   :  { %v1320_v17 = vrot.slane %v1312_v54, %v3225_v11  ;;  %v1327_v19 = vrot.slane %v1313_v61, %v3225_v11  ;;  %v1074_v54 = vpop.permute.xlu0 %1073  ;;  %v3560_v61 = vld [vmem:[#allocation26_spill] sm:$0xff] }
 0x1fd   :  { %v3244_v25 = vmul.f32 %v3560_v61, %v2794_v27  ;;  %v1233_v22 = vsel %vm1181_vm0, %v542_v50, %v1008_v58  ;;  %v1201_v27 = vsel %vm1198_vm1, %v1184_v13, %v3131_v44  ;;  %v1250_v57 = vsel %vm1198_vm1, %v1234_v36, %v1074_v54 }
 0x1fe   :  { %v1328_v38 = vcombine.high %v1320_v17, %v1320_v17  ;;  %v1329_v1 = vcombine.high %v1327_v19, %v1327_v19  ;;  %v1072_v55 = vpop.permute.xlu1 %1071  ;;  %v1664_v61 = vmul.f32 %v1320_v17, %v29_v45  ;;  %v1666_v33 = vmul.f32 %v1327_v19, %v31_v60  ;;  %v33_v60 = vld [vmem:[#allocation2 + $0x10] sm:$0xf]  ;;  %v34_v17 = vld [vmem:[#allocation2 + $0x14] sm:$0xf] }
 0x1ff   :  { %v1249_v9 = vsel %vm1198_vm1, %v1233_v22, %v1072_v55  ;;  %v1218_v58 = vsel %vm1215_vm2, %v1201_v27, %v946_v41  ;;  %v544_v55 = vmul.f32 %v3562_v2, %v2689_v4  ;;  %v1185_v45 = vsel %vm1181_vm0, %v224_v53, %v3005_v56  ;;  %v37_v22 = vld [vmem:[#allocation2 + $0x20] sm:$0xf] }
 0x200   :  { %v1665_v10 = vmul.f32 %v1328_v38, %v30_v52  ;;  %v1667_v48 = vmul.f32 %v1329_v1, %v32_v39  ;;  %v1186_v54 = vsel %vm1181_vm0, %v225_v51, %v3066_v40  ;;  %v1202_v13 = vsel %vm1198_vm1, %v1185_v45, %v3078_v49  ;;  %v38_v40 = vld [vmem:[#allocation2 + $0x24] sm:$0xf]  ;;  %v39_v51 = vld [vmem:[#allocation2 + $0x28] sm:$0xf] }
 0x201   :  { %v1219_v27 = vsel %vm1215_vm2, %v1202_v13, %v3183_v20 }
 0x202   :  { %v1136_v46 = vpop.permute.xlu1 %1135  ;;  %v1792_v39 = vcombine.low %v1664_v61, %v1665_v10  ;;  %v1793_v35 = vcombine.low %v1666_v33, %v1667_v48  ;;  %v35_v48 = vld [vmem:[#allocation2 + $0x18] sm:$0xf]  ;;  %v1203_v10 = vsel %vm1198_vm1, %v1186_v54, %v3141_v32 }
 0x203   :  { %v1265_v23 = vsel %vm1215_vm2, %v1249_v9, %v1136_v46  ;;  %v1138_v63 = vpop.permute.xlu0 %1137  ;;  %v40_v9 = vld [vmem:[#allocation2 + $0x2c] sm:$0xf] }
 0x204   :  { %v1330_v38 = vcombine.low %v1217_v28, %v1265_v23  ;;  %v1331_v1 = vcombine.high %v1217_v28, %v1265_v23  ;;  %v1266_v44 = vsel %vm1215_vm2, %v1250_v57, %v1138_v63  ;;  %v1800_v57 = vrot.slane %v1792_v39, %v3225_v11 }
 0x205   :  { %v1348_v52 = vcombine.low %v1218_v58, %v1266_v44  ;;  %v1349_v18 = vcombine.high %v1218_v58, %v1266_v44  ;;  %v1807_v61 = vrot.slane %v1793_v35, %v3225_v11 }
 0x206   :  { %v1338_v19 = vrot.slane %v1330_v38, %v3225_v11  ;;  %v1345_v41 = vrot.slane %v1331_v1, %v3225_v11  ;;  %v1012_v50 = vpop.permute.xlu1 %1011 }
 0x207   :  { %v1356_v4 = vrot.slane %v1348_v52, %v3225_v11  ;;  %v1363_v56 = vrot.slane %v1349_v18, %v3225_v11  ;;  %v1014_v53 = vpop.permute.xlu0 %1013  ;;  %v1220_v18 = vsel %vm1215_vm2, %v1203_v10, %v3213_v29  ;;  %v1235_v54 = vsel %vm1181_vm0, %v544_v55, %v1012_v50 }
 0x208   :  { %v1346_v28 = vcombine.high %v1338_v19, %v1338_v19  ;;  %v1347_v36 = vcombine.high %v1345_v41, %v1345_v41  ;;  %v1668_v33 = vmul.f32 %v1338_v19, %v33_v60  ;;  %v1670_v63 = vmul.f32 %v1345_v41, %v35_v48 }
 0x209   :  { %v1364_v49 = vcombine.high %v1356_v4, %v1356_v4  ;;  %v1365_v46 = vcombine.high %v1363_v56, %v1363_v56  ;;  %v1672_v32 = vmul.f32 %v1356_v4, %v37_v22  ;;  %v1674_v44 = vmul.f32 %v1363_v56, %v39_v51  ;;  %v41_v51 = vld [vmem:[#allocation2 + $0x30] sm:$0xf] }
 0x20a   :  { %v1669_v23 = vmul.f32 %v1346_v28, %v34_v17  ;;  %v1671_v58 = vmul.f32 %v1347_v36, %v36_v62  ;;  %v1076_v38 = vpop.permute.xlu1 %1075  ;;  %v1236_v35 = vsel %vm1181_vm0, %v3244_v25, %v1014_v53  ;;  %v1808_v60 = vcombine.low %v1800_v57, %v1807_v61 }
 0x20b   :  { %v1673_v1 = vmul.f32 %v1364_v49, %v38_v40  ;;  %v1675_v20 = vmul.f32 %v1365_v46, %v40_v9  ;;  %v1078_v52 = vpop.permute.xlu0 %1077  ;;  %v1251_v17 = vsel %vm1198_vm1, %v1235_v54, %v1076_v38  ;;  %v1809_v62 = vcombine.high %v1800_v57, %v1807_v61  ;;  %v42_v9 = vld [vmem:[#allocation2 + $0x34] sm:$0xf]  ;;  %v48_v54 = vld [vmem:[#allocation2 + $0x4c] sm:$0xf] }
 0x20c   :  { %v1810_v2 = vcombine.low %v1668_v33, %v1669_v23  ;;  %v1811_v45 = vcombine.low %v1670_v63, %v1671_v58  ;;  %v1252_v29 = vsel %vm1198_vm1, %v1236_v35, %v1078_v52  ;;  %v43_v33 = vld [vmem:[#allocation2 + $0x38] sm:$0xf]  ;;  %v44_v23 = vld [vmem:[#allocation2 + $0x3c] sm:$0xf]  ;;  %v45_v63 = vld [vmem:[#allocation2 + $0x40] sm:$0xf] }
 0x20d   :  { %v1828_v39 = vcombine.low %v1672_v32, %v1673_v1  ;;  %v1829_v13 = vcombine.low %v1674_v44, %v1675_v20  ;;  %v3563_v44 = vld [vmem:[#allocation12_spill] sm:$0xff] }
 0x20e   :  { %v1140_v19 = vpop.permute.xlu1 %1139  ;;  %v1818_v41 = vrot.slane %v1810_v2, %v3225_v11  ;;  %v1825_v48 = vrot.slane %v1811_v45, %v3225_v11  ;;  %v226_v20 = vmul.f32 %v3563_v44, %v2702_v12  ;;  %v46_v2 = vld [vmem:[#allocation2 + $0x44] sm:$0xf]  ;;  %v47_v45 = vld [vmem:[#allocation2 + $0x48] sm:$0xf] }
 0x20f   :  { %v1267_v22 = vsel %vm1215_vm2, %v1251_v17, %v1140_v19  ;;  %v1142_v4 = vpop.permute.xlu0 %1141  ;;  %v1836_v55 = vrot.slane %v1828_v39, %v3225_v11  ;;  %v1843_v50 = vrot.slane %v1829_v13, %v3225_v11  ;;  %v2112_v39 = vadd.f32 %v1809_v62, %v1808_v60  ;;  %v3564_v13 = vld [vmem:[#allocation34_spill] sm:$0xff] }
 0x210   :  { %v1366_v56 = vcombine.low %v1219_v27, %v1267_v22  ;;  %v1367_v25 = vcombine.high %v1219_v27, %v1267_v22  ;;  %v1268_v53 = vsel %vm1215_vm2, %v1252_v29, %v1142_v4  ;;  %v1826_v10 = vcombine.low %v1818_v41, %v1825_v48 }
 0x211   :  { %v1384_v28 = vcombine.low %v1220_v18, %v1268_v53  ;;  %v1385_v36 = vcombine.high %v1220_v18, %v1268_v53  ;;  %v1827_v40 = vcombine.high %v1818_v41, %v1825_v48  ;;  %v1844_v61 = vcombine.low %v1836_v55, %v1843_v50 }
 0x212   :  { %v1374_v49 = vrot.slane %v1366_v56, %v3225_v11  ;;  %v1381_v46 = vrot.slane %v1367_v25, %v3225_v11  ;;  %v1016_v57 = vpop.permute.xlu1 %1015  ;;  %v1845_v1 = vcombine.high %v1836_v55, %v1843_v50  ;;  %v546_v35 = vmul.f32 %v3564_v13, %v2702_v12  ;;  %v50_v13 = vld [vmem:[#allocation2 + $0x54] sm:$0xf] }
 0x213   :  { %v1392_v58 = vrot.slane %v1384_v28, %v3225_v11  ;;  %v1399_v27 = vrot.slane %v1385_v36, %v3225_v11  ;;  %v3300_v38 = vpop.permute.xlu0 %1017  ;;  %v2115_v32 = vadd.f32 %v1827_v40, %v1826_v10  ;;  %v1187_v12 = vsel %vm1181_vm0, %v226_v20, %v3012_v6  ;;  %v3565_v20 = vld [vmem:[#allocation15_spill] sm:$0xff] }
 0x214   :  { %v1382_v52 = vcombine.high %v1374_v49, %v1374_v49  ;;  %v1383_v18 = vcombine.high %v1381_v46, %v1381_v46  ;;  %v1676_v17 = vmul.f32 %v1374_v49, %v41_v51  ;;  %v1678_v29 = vmul.f32 %v1381_v46, %v43_v33 }
 0x215   :  { %v1400_v19 = vcombine.high %v1392_v58, %v1392_v58  ;;  %v1401_v41 = vcombine.high %v1399_v27, %v1399_v27  ;;  %2116 = vadd.xlane.f32.xlu0 %v2115_v32  ;;  %v1680_v4 = vmul.f32 %v1392_v58, %v45_v63  ;;  %2113 = vadd.xlane.f32.xlu1 %v2112_v39 }
 0x216   :  { %v1677_v48 = vmul.f32 %v1382_v52, %v42_v9  ;;  %v1679_v22 = vmul.f32 %v1383_v18, %v44_v23  ;;  %v1080_v55 = vpop.permute.xlu1 %1079  ;;  %v1682_v56 = vmul.f32 %v1399_v27, %v47_v45  ;;  %v2118_v10 = vadd.f32 %v1845_v1, %v1844_v61  ;;  %v3566_v18 = vld [vmem:[#allocation28_spill] sm:$0xff] }
 0x217   :  { %v1681_v50 = vmul.f32 %v1400_v19, %v46_v2  ;;  %v1683_v25 = vmul.f32 %v1401_v41, %v48_v54  ;;  %v1082_v53 = vpop.permute.xlu0 %1081  ;;  %v1237_v40 = vsel %vm1181_vm0, %v546_v35, %v1016_v57  ;;  %v1204_v51 = vsel %vm1198_vm1, %v1187_v12, %v3088_v16  ;;  %v51_v35 = vld [vmem:[#allocation2 + $0x58] sm:$0xf] }
 0x218   :  { %v1846_v28 = vcombine.low %v1676_v17, %v1677_v48  ;;  %v1847_v60 = vcombine.low %v1678_v29, %v1679_v22  ;;  %v1253_v9 = vsel %vm1198_vm1, %v1237_v40, %v1080_v55  ;;  %v1221_v33 = vsel %vm1215_vm2, %v1204_v51, %v3197_v21  ;;  %v49_v21 = vld [vmem:[#allocation2 + $0x50] sm:$0xf]  ;;  %v52_v17 = vld [vmem:[#allocation2 + $0x5c] sm:$0xf] }
 0x219   :  { %v1864_v62 = vcombine.low %v1680_v4, %v1681_v50  ;;  %v1865_v36 = vcombine.low %v1682_v56, %v1683_v25  ;;  %2119 = vadd.xlane.f32.xlu0 %v2118_v10  ;;  %v227_v52 = vmul.f32 %v3565_v20, %v2807_v3  ;;  %v547_v2 = vmul.f32 %v3566_v18, %v2807_v3 }
 0x21a   :  { %v1144_v49 = vpop.permute.xlu1 %1143  ;;  %v1854_v46 = vrot.slane %v1846_v28, %v3225_v11  ;;  %v1861_v61 = vrot.slane %v1847_v60, %v3225_v11 }
 0x21b   :  { %v1269_v6 = vsel %vm1215_vm2, %v1253_v9, %v1144_v49  ;;  %v1020_v23 = vpop.permute.xlu0 %1019  ;;  %v1872_v63 = vrot.slane %v1864_v62, %v3225_v11  ;;  %v1879_v57 = vrot.slane %v1865_v36, %v3225_v11  ;;  %v1188_v29 = vsel %vm1181_vm0, %v227_v52, %v3076_v7  ;;  %v3568_v49 = vld [vmem:[#allocation36_spill] sm:$0xff] }
 0x21c   :  { %v1402_v58 = vcombine.low %v1221_v33, %v1269_v6  ;;  %v1403_v27 = vcombine.high %v1221_v33, %v1269_v6  ;;  %v1862_v16 = vcombine.low %v1854_v46, %v1861_v61  ;;  %v1863_v32 = vcombine.high %v1854_v46, %v1861_v61  ;;  %v53_v61 = vld [vmem:[#allocation2 + $0x60] sm:$0xf] }
 0x21d   :  { %v1880_v1 = vcombine.low %v1872_v63, %v1879_v57  ;;  %v1881_v44 = vcombine.high %v1872_v63, %v1879_v57  ;;  %v1238_v22 = vsel %vm1181_vm0, %v547_v2, %v3300_v38  ;;  %v1205_v55 = vsel %vm1198_vm1, %v1188_v29, %v3149_v15  ;;  %v2246_v15 = vld [vmem:[%s3503_s2 + $0x38] sm:$0xff] }
 0x21e   :  { %v1410_v45 = vrot.slane %v1402_v58, %v3225_v11  ;;  %v1417_v54 = vrot.slane %v1403_v27, %v3225_v11  ;;  %v954_v39 = vpop.permute.xlu1 %953  ;;  %v2121_v41 = vadd.f32 %v1863_v32, %v1862_v16  ;;  %v1254_v50 = vsel %vm1198_vm1, %v1238_v22, %v1082_v53  ;;  %v3567_v53 = vld [vmem:[#allocation14_spill] sm:$0xff]  ;;  %v54_v27 = vld [vmem:[#allocation2 + $0x64] sm:$0xf]  ;;  %v55_v16 = vld [vmem:[#allocation2 + $0x68] sm:$0xf] }
 0x21f   :  { %v1084_v19 = vpop.permute.xlu0 %1083  ;;  %v2124_v48 = vadd.f32 %v1881_v44, %v1880_v1  ;;  %v1222_v12 = vsel %vm1215_vm2, %v1205_v55, %v954_v39  ;;  %v228_v9 = vmul.f32 %v2246_v15, %v3567_v53  ;;  %v548_v46 = vmul.f32 %v2246_v15, %v3568_v49  ;;  %v56_v32 = vld [vmem:[#allocation2 + $0x6c] sm:$0xf] }
 0x220   :  { %v1418_v4 = vcombine.high %v1410_v45, %v1410_v45  ;;  %v1419_v3 = vcombine.high %v1417_v54, %v1417_v54  ;;  %2122 = vadd.xlane.f32.xlu1 %v2121_v41  ;;  %v1684_v56 = vmul.f32 %v1410_v45, %v49_v21  ;;  %v1686_v10 = vmul.f32 %v1417_v54, %v51_v35 }
 0x221   :  { %2125 = vadd.xlane.f32.xlu0 %v2124_v48  ;;  %v1189_v44 = vsel %vm1181_vm0, %v228_v9, %v3021_v0  ;;  %v1239_v20 = vsel %vm1181_vm0, %v548_v46, %v1020_v23 }
 0x222   :  { %v1685_v25 = vmul.f32 %v1418_v4, %v50_v13  ;;  %v1687_v28 = vmul.f32 %v1419_v3, %v52_v17  ;;  %v1146_v60 = vpop.permute.xlu1 %1145  ;;  %v1206_v2 = vsel %vm1198_vm1, %v1189_v44, %v3101_v30  ;;  %v1255_v21 = vsel %vm1198_vm1, %v1239_v20, %v1084_v19  ;;  %v3569_v30 = vld [vmem:[#allocation17_spill] sm:$0xff] }
 0x223   :  { %v1270_v7 = vsel %vm1215_vm2, %v1254_v50, %v1146_v60  ;;  %v1022_v62 = vpop.permute.xlu0 %1021  ;;  %v229_v19 = vmul.f32 %v3569_v30, %v2822_v59  ;;  %v3570_v50 = vld [vmem:[#allocation30_spill] sm:$0xff] }
 0x224   :  { %v1882_v38 = vcombine.low %v1684_v56, %v1685_v25  ;;  %v1883_v36 = vcombine.low %v1686_v10, %v1687_v28  ;;  %v1420_v40 = vcombine.low %v1222_v12, %v1270_v7  ;;  %v1421_v51 = vcombine.high %v1222_v12, %v1270_v7  ;;  %v57_v25 = vld [vmem:[#allocation2 + $0x70] sm:$0xf] }
 0x225   :  { %v549_v56 = vmul.f32 %v3570_v50, %v2822_v59  ;;  %v1190_v15 = vsel %vm1181_vm0, %v229_v19, %v3086_v5 }
 0x226   :  { %v1428_v33 = vrot.slane %v1420_v40, %v3225_v11  ;;  %v1435_v6 = vrot.slane %v1421_v51, %v3225_v11  ;;  %v956_v63 = vpop.permute.xlu1 %955  ;;  %v1890_v57 = vrot.slane %v1882_v38, %v3225_v11  ;;  %v1897_v58 = vrot.slane %v1883_v36, %v3225_v11  ;;  %v58_v38 = vld [vmem:[#allocation2 + $0x74] sm:$0xf]  ;;  %v59_v36 = vld [vmem:[#allocation2 + $0x78] sm:$0xf]  ;;  %v60_v40 = vld [vmem:[#allocation2 + $0x7c] sm:$0xf] }
 0x227   :  { %v1086_v1 = vpop.permute.xlu0 %1085  ;;  %v1223_v48 = vsel %vm1215_vm2, %v1206_v2, %v956_v63  ;;  %v1240_v59 = vsel %vm1181_vm0, %v549_v56, %v1022_v62  ;;  %v1207_v49 = vsel %vm1198_vm1, %v1190_v15, %v3159_v42  ;;  %v2247_v42 = vld [vmem:[%s3503_s2 + $0x48] sm:$0xff] }
 0x228   :  { %v1436_v52 = vcombine.high %v1428_v33, %v1428_v33  ;;  %v1437_v18 = vcombine.high %v1435_v6, %v1435_v6  ;;  %v1898_v45 = vcombine.low %v1890_v57, %v1897_v58  ;;  %v1899_v54 = vcombine.high %v1890_v57, %v1897_v58 }
 0x229   :  { %v1688_v39 = vmul.f32 %v1428_v33, %v53_v61  ;;  %v1690_v35 = vmul.f32 %v1435_v6, %v55_v16  ;;  %v1256_v46 = vsel %vm1198_vm1, %v1240_v59, %v1086_v1  ;;  %v3571_v1 = vld [vmem:[#allocation16_spill] sm:$0xff] }
 0x22a   :  { %v1689_v13 = vmul.f32 %v1436_v52, %v54_v27  ;;  %v1691_v17 = vmul.f32 %v1437_v18, %v56_v32  ;;  %v1148_v41 = vpop.permute.xlu1 %1147  ;;  %v2127_v23 = vadd.f32 %v1899_v54, %v1898_v45  ;;  %v230_v2 = vmul.f32 %v2247_v42, %v3571_v1  ;;  %v61_v54 = vld [vmem:[#allocation2 + $0x80] sm:$0xf] }
 0x22b   :  { %v1271_v0 = vsel %vm1215_vm2, %v1255_v21, %v1148_v41  ;;  %v1024_v29 = vpop.permute.xlu0 %1023  ;;  %v3572_v21 = vld [vmem:[#allocation38_spill] sm:$0xff] }
 0x22c   :  { %v1900_v22 = vcombine.low %v1688_v39, %v1689_v13  ;;  %v1901_v4 = vcombine.low %v1690_v35, %v1691_v17  ;;  %v1438_v3 = vcombine.low %v1223_v48, %v1271_v0  ;;  %v1439_v55 = vcombine.high %v1223_v48, %v1271_v0  ;;  %2128 = vadd.xlane.f32.xlu1 %v2127_v23  ;;  %v62_v48 = vld [vmem:[#allocation2 + $0x84] sm:$0xf]  ;;  %v63_v0 = vld [vmem:[#allocation2 + $0x88] sm:$0xf]  ;;  %v64_v23 = vld [vmem:[#allocation2 + $0x8c] sm:$0xf] }
 0x22d   :  { %v550_v45 = vmul.f32 %v2247_v42, %v3572_v21 }
 0x22e   :  { %v1446_v10 = vrot.slane %v1438_v3, %v3225_v11  ;;  %v1453_v28 = vrot.slane %v1439_v55, %v3225_v11  ;;  %v958_v60 = vpop.permute.xlu1 %957  ;;  %v1908_v12 = vrot.slane %v1900_v22, %v3225_v11  ;;  %v1915_v7 = vrot.slane %v1901_v4, %v3225_v11 }
 0x22f   :  { %v1088_v51 = vpop.permute.xlu0 %1087  ;;  %v1224_v16 = vsel %vm1215_vm2, %v1207_v49, %v958_v60  ;;  %v1191_v4 = vsel %vm1181_vm0, %v230_v2, %v3030_v8  ;;  %v1241_v3 = vsel %vm1181_vm0, %v550_v45, %v1024_v29  ;;  %v3574_v49 = vld [vmem:[#allocation32_spill] sm:$0xff] }
 0x230   :  { %v1454_v53 = vcombine.high %v1446_v10, %v1446_v10  ;;  %v1455_v9 = vcombine.high %v1453_v28, %v1453_v28  ;;  %v1916_v61 = vcombine.low %v1908_v12, %v1915_v7  ;;  %v1917_v33 = vcombine.high %v1908_v12, %v1915_v7 }
 0x231   :  { %v1692_v6 = vmul.f32 %v1446_v10, %v57_v25  ;;  %v1694_v57 = vmul.f32 %v1453_v28, %v59_v36  ;;  %v1208_v19 = vsel %vm1198_vm1, %v1191_v4, %v3111_v26  ;;  %v1257_v50 = vsel %vm1198_vm1, %v1241_v3, %v1088_v51  ;;  %v2248_v26 = vld [vmem:[%s3503_s2 + $0x50] sm:$0xff]  ;;  %v3573_v51 = vld [vmem:[#allocation19_spill] sm:$0xff] }
 0x232   :  { %v1693_v63 = vmul.f32 %v1454_v53, %v58_v38  ;;  %v1695_v58 = vmul.f32 %v1455_v9, %v60_v40  ;;  %v1150_v27 = vpop.permute.xlu1 %1149  ;;  %v2130_v62 = vadd.f32 %v1917_v33, %v1916_v61  ;;  %v231_v9 = vmul.f32 %v2248_v26, %v3573_v51  ;;  %v65_v61 = vld [vmem:[#allocation2 + $0x90] sm:$0xf] }
 0x233   :  { %v1272_v5 = vsel %vm1215_vm2, %v1256_v46, %v1150_v27  ;;  %v1026_v32 = vpop.permute.xlu0 %1025  ;;  %v551_v46 = vmul.f32 %v2248_v26, %v3574_v49  ;;  %v66_v27 = vld [vmem:[#allocation2 + $0x94] sm:$0xf] }
 0x234   :  { %v1918_v44 = vcombine.low %v1692_v6, %v1693_v63  ;;  %v1919_v20 = vcombine.low %v1694_v57, %v1695_v58  ;;  %v1456_v52 = vcombine.low %v1224_v16, %v1272_v5  ;;  %v1457_v18 = vcombine.high %v1224_v16, %v1272_v5  ;;  %2131 = vadd.xlane.f32.xlu0 %v2130_v62  ;;  %v67_v16 = vld [vmem:[#allocation2 + $0x98] sm:$0xf]  ;;  %v68_v5 = vld [vmem:[#allocation2 + $0x9c] sm:$0xf] }
 0x236   :  { %v1464_v39 = vrot.slane %v1456_v52, %v3225_v11  ;;  %v1471_v13 = vrot.slane %v1457_v18, %v3225_v11  ;;  %v960_v35 = vpop.permute.xlu1 %959  ;;  %v1926_v17 = vrot.slane %v1918_v44, %v3225_v11  ;;  %v1933_v41 = vrot.slane %v1919_v20, %v3225_v11 }
 0x237   :  { %v1090_v22 = vpop.permute.xlu0 %1089  ;;  %v1225_v38 = vsel %vm1215_vm2, %v1208_v19, %v960_v35  ;;  %v1192_v44 = vsel %vm1181_vm0, %v231_v9, %v3095_v43  ;;  %v1242_v20 = vsel %vm1181_vm0, %v551_v46, %v1026_v32  ;;  %v69_v19 = vld [vmem:[#allocation2 + $0xa0] sm:$0xf] }
 0x238   :  { %v1472_v55 = vcombine.high %v1464_v39, %v1464_v39  ;;  %v1473_v30 = vcombine.high %v1471_v13, %v1471_v13  ;;  %v1934_v56 = vcombine.low %v1926_v17, %v1933_v41  ;;  %v1935_v25 = vcombine.high %v1926_v17, %v1933_v41 }
 0x239   :  { %v1696_v10 = vmul.f32 %v1464_v39, %v61_v54  ;;  %v1698_v60 = vmul.f32 %v1471_v13, %v63_v0  ;;  %v1209_v42 = vsel %vm1198_vm1, %v1192_v44, %v3169_v31  ;;  %v1258_v1 = vsel %vm1198_vm1, %v1242_v20, %v1090_v22  ;;  %v2249_v31 = vld [vmem:[%s3503_s2 + $0x58] sm:$0xff] }
 0x23a   :  { %v1697_v28 = vmul.f32 %v1472_v55, %v62_v48  ;;  %v1699_v12 = vmul.f32 %v1473_v30, %v64_v23  ;;  %v1152_v7 = vpop.permute.xlu1 %1151  ;;  %v2133_v29 = vadd.f32 %v1935_v25, %v1934_v56  ;;  %v3575_v22 = vld [vmem:[#allocation18_spill] sm:$0xff]  ;;  %v3576_v55 = vld [vmem:[#allocation39_spill] sm:$0xff] }
 0x23b   :  { %v1273_v8 = vsel %vm1215_vm2, %v1257_v50, %v1152_v7  ;;  %v1028_v36 = vpop.permute.xlu0 %1027  ;;  %v232_v3 = vmul.f32 %v2249_v31, %v3575_v22  ;;  %v552_v30 = vmul.f32 %v2249_v31, %v3576_v55  ;;  %v72_v7 = vld [vmem:[#allocation2 + $0xac] sm:$0xf]  ;;  %v3578_v44 = vld [vmem:[#allocation35_spill] sm:$0xff] }
 0x23c   :  { %v1936_v40 = vcombine.low %v1696_v10, %v1697_v28  ;;  %v1937_v15 = vcombine.low %v1698_v60, %v1699_v12  ;;  %v1474_v59 = vcombine.low %v1225_v38, %v1273_v8  ;;  %v1475_v53 = vcombine.high %v1225_v38, %v1273_v8  ;;  %2134 = vadd.xlane.f32.xlu1 %v2133_v29  ;;  %v70_v60 = vld [vmem:[#allocation2 + $0xa4] sm:$0xf]  ;;  %v71_v12 = vld [vmem:[#allocation2 + $0xa8] sm:$0xf] }
 0x23d   :  { %v1193_v8 = vsel %vm1181_vm0, %v232_v3, %v3039_v24  ;;  %v1243_v29 = vsel %vm1181_vm0, %v552_v30, %v1028_v36 }
 0x23e   :  { %v1482_v33 = vrot.slane %v1474_v59, %v3225_v11  ;;  %v1489_v6 = vrot.slane %v1475_v53, %v3225_v11  ;;  %v962_v63 = vpop.permute.xlu1 %961  ;;  %v1944_v57 = vrot.slane %v1936_v40, %v3225_v11  ;;  %v1951_v58 = vrot.slane %v1937_v15, %v3225_v11 }
 0x23f   :  { %v1092_v62 = vpop.permute.xlu0 %1091  ;;  %v1226_v17 = vsel %vm1215_vm2, %v1209_v42, %v962_v63  ;;  %v1210_v59 = vsel %vm1198_vm1, %v1193_v8, %v3127_v34  ;;  %v2250_v34 = vld [vmem:[%s3503_s2 + $0x60] sm:$0xff] }
 0x240   :  { %v1490_v52 = vcombine.high %v1482_v33, %v1482_v33  ;;  %v1491_v18 = vcombine.high %v1489_v6, %v1489_v6  ;;  %v1952_v2 = vcombine.low %v1944_v57, %v1951_v58  ;;  %v1953_v21 = vcombine.high %v1944_v57, %v1951_v58  ;;  %v77_v8 = vld [vmem:[#allocation2 + $0xc0] sm:$0xf] }
 0x241   :  { %v1700_v45 = vmul.f32 %v1482_v33, %v65_v61  ;;  %v1702_v39 = vmul.f32 %v1489_v6, %v67_v16  ;;  %v1259_v53 = vsel %vm1198_vm1, %v1243_v29, %v1092_v62  ;;  %v553_v20 = vmul.f32 %v2250_v34, %v3578_v44 }
 0x242   :  { %v1701_v54 = vmul.f32 %v1490_v52, %v66_v27  ;;  %v1703_v13 = vmul.f32 %v1491_v18, %v68_v5  ;;  %v1154_v35 = vpop.permute.xlu1 %1153  ;;  %v2136_v32 = vadd.f32 %v1953_v21, %v1952_v2  ;;  %v3577_v5 = vld [vmem:[#allocation21_spill] sm:$0xff] }
 0x243   :  { %v1274_v43 = vsel %vm1215_vm2, %v1258_v1, %v1154_v35  ;;  %v1030_v41 = vpop.permute.xlu0 %1029  ;;  %v233_v62 = vmul.f32 %v2250_v34, %v3577_v5  ;;  %v73_v52 = vld [vmem:[#allocation2 + $0xb0] sm:$0xf] }
 0x244   :  { %v1954_v48 = vcombine.low %v1700_v45, %v1701_v54  ;;  %v1955_v0 = vcombine.low %v1702_v39, %v1703_v13  ;;  %v1492_v23 = vcombine.low %v1226_v17, %v1274_v43  ;;  %v1493_v4 = vcombine.high %v1226_v17, %v1274_v43  ;;  %2137 = vadd.xlane.f32.xlu0 %v2136_v32  ;;  %v74_v45 = vld [vmem:[#allocation2 + $0xb4] sm:$0xf]  ;;  %v75_v54 = vld [vmem:[#allocation2 + $0xb8] sm:$0xf]  ;;  %v76_v39 = vld [vmem:[#allocation2 + $0xbc] sm:$0xf] }
 0x245   :  { %v1194_v35 = vsel %vm1181_vm0, %v233_v62, %v3105_v37  ;;  %v1244_v17 = vsel %vm1181_vm0, %v553_v20, %v1030_v41 }
 0x246   :  { %v1500_v50 = vrot.slane %v1492_v23, %v3225_v11  ;;  %v1507_v56 = vrot.slane %v1493_v4, %v3225_v11  ;;  %v964_v25 = vpop.permute.xlu1 %963  ;;  %v1962_v10 = vrot.slane %v1954_v48, %v3225_v11  ;;  %v1969_v28 = vrot.slane %v1955_v0, %v3225_v11 }
 0x247   :  { %v1094_v38 = vpop.permute.xlu0 %1093  ;;  %v1227_v6 = vsel %vm1215_vm2, %v1210_v59, %v964_v25  ;;  %v1211_v48 = vsel %vm1198_vm1, %v1194_v35, %v3177_v14  ;;  %v2251_v14 = vld [vmem:[%s3503_s2 + $0x68] sm:$0xff] }
 0x248   :  { %v1508_v40 = vcombine.high %v1500_v50, %v1500_v50  ;;  %v1509_v15 = vcombine.high %v1507_v56, %v1507_v56  ;;  %v1970_v26 = vcombine.low %v1962_v10, %v1969_v28  ;;  %v1971_v51 = vcombine.high %v1962_v10, %v1969_v28 }
 0x249   :  { %v1704_v9 = vmul.f32 %v1500_v50, %v69_v19  ;;  %v1706_v46 = vmul.f32 %v1507_v56, %v71_v12  ;;  %v1260_v0 = vsel %vm1198_vm1, %v1244_v17, %v1094_v38 }
 0x24a   :  { %v1705_v49 = vmul.f32 %v1508_v40, %v70_v60  ;;  %v1707_v61 = vmul.f32 %v1509_v15, %v72_v7  ;;  %v1156_v33 = vpop.permute.xlu1 %1155  ;;  %v2139_v36 = vadd.f32 %v1971_v51, %v1970_v26  ;;  %v3579_v60 = vld [vmem:[#allocation20_spill] sm:$0xff] }
 0x24b   :  { %v1275_v24 = vsel %vm1215_vm2, %v1259_v53, %v1156_v33  ;;  %v1032_v63 = vpop.permute.xlu0 %1031  ;;  %v234_v12 = vmul.f32 %v2251_v14, %v3579_v60  ;;  %v3580_v7 = vld [vmem:[#allocation40_spill] sm:$0xff] }
 0x24c   :  { %v1972_v57 = vcombine.low %v1704_v9, %v1705_v49  ;;  %v1973_v58 = vcombine.low %v1706_v46, %v1707_v61  ;;  %v1510_v27 = vcombine.low %v1227_v6, %v1275_v24  ;;  %v1511_v16 = vcombine.high %v1227_v6, %v1275_v24  ;;  %2140 = vadd.xlane.f32.xlu1 %v2139_v36  ;;  %v78_v26 = vld [vmem:[#allocation2 + $0xc4] sm:$0xf]  ;;  %v79_v51 = vld [vmem:[#allocation2 + $0xc8] sm:$0xf]  ;;  %v80_v9 = vld [vmem:[#allocation2 + $0xcc] sm:$0xf] }
 0x24d   :  { %v554_v38 = vmul.f32 %v2251_v14, %v3580_v7  ;;  %v1195_v46 = vsel %vm1181_vm0, %v234_v12, %v3049_v47  ;;  %v3581_v24 = vld [vmem:[#allocation44_spill] sm:$0xff] }
 0x24e   :  { %v1518_v18 = vrot.slane %v1510_v27, %v3225_v11  ;;  %v1525_v42 = vrot.slane %v1511_v16, %v3225_v11  ;;  %v966_v1 = vpop.permute.xlu1 %965  ;;  %v1980_v2 = vrot.slane %v1972_v57, %v3225_v11  ;;  %v1987_v21 = vrot.slane %v1973_v58, %v3225_v11 }
 0x24f   :  { %v1096_v13 = vpop.permute.xlu0 %1095  ;;  %v1228_v19 = vsel %vm1215_vm2, %v1211_v48, %v966_v1  ;;  %v1245_v61 = vsel %vm1181_vm0, %v554_v38, %v1032_v63  ;;  %v1212_v36 = vsel %vm1198_vm1, %v1195_v46, %v3581_v24  ;;  %v82_v48 = vld [vmem:[#allocation2 + $0xd4] sm:$0xf]  ;;  %v3585_v38 = vld [vmem:[#allocation43_spill] sm:$0xff] }
 0x250   :  { %v1526_v43 = vcombine.high %v1518_v18, %v1518_v18  ;;  %v1527_v32 = vcombine.high %v1525_v42, %v1525_v42  ;;  %v1988_v23 = vcombine.low %v1980_v2, %v1987_v21  ;;  %v1989_v4 = vcombine.high %v1980_v2, %v1987_v21  ;;  %v2252_v21 = vld [vmem:[%s3503_s2 + $0x70] sm:$0xff] }
 0x251   :  { %v1708_v31 = vmul.f32 %v1518_v18, %v73_v52  ;;  %v1710_v3 = vmul.f32 %v1525_v42, %v75_v54  ;;  %v1261_v57 = vsel %vm1198_vm1, %v1245_v61, %v1096_v13 }
 0x252   :  { %v1709_v22 = vmul.f32 %v1526_v43, %v74_v45  ;;  %v1711_v55 = vmul.f32 %v1527_v32, %v76_v39  ;;  %v1158_v30 = vpop.permute.xlu1 %1157  ;;  %v2142_v41 = vadd.f32 %v1989_v4, %v1988_v23  ;;  %v3582_v45 = vld [vmem:[#allocation37_spill] sm:$0xff]  ;;  %v84_v23 = vld [vmem:[#allocation2 + $0xdc] sm:$0xf] }
 0x253   :  { %v1276_v37 = vsel %vm1215_vm2, %v1260_v0, %v1158_v30  ;;  %v1034_v50 = vpop.permute.xlu0 %1033  ;;  %v555_v54 = vmul.f32 %v2252_v21, %v3582_v45  ;;  %v81_v39 = vld [vmem:[#allocation2 + $0xd0] sm:$0xf]  ;;  %v83_v0 = vld [vmem:[#allocation2 + $0xd8] sm:$0xf] }
 0x254   :  { %v1990_v56 = vcombine.low %v1708_v31, %v1709_v22  ;;  %v1991_v25 = vcombine.low %v1710_v3, %v1711_v55  ;;  %v1528_v10 = vcombine.low %v1228_v19, %v1276_v37  ;;  %v1529_v28 = vcombine.high %v1228_v19, %v1276_v37  ;;  %2143 = vadd.xlane.f32.xlu0 %v2142_v41  ;;  %v2253_v31 = vld [vmem:[%s3503_s2 + $0x78] sm:$0xff]  ;;  %v3584_v37 = vld [vmem:[#allocation41_spill] sm:$0xff]  ;;  %s2316_s2 = smov [#allocation5]  }
 0x255   :  { %v3583_v22 = vld [vmem:[#allocation22_spill] sm:$0xff]  ;;  %v1246_v55 = vsel %vm1181_vm0, %v555_v54, %v1034_v50  ;;  %v556_v41 = vmul.f32 %v2253_v31, %v3584_v37  ;;  %s2206_s25 = sshll.u32 %s2316_s2, 4  ;;  %s2207_s25 = int_to_ptr.vmem [resolvable:$true] %s2206_s25 }
 0x256   :  { %v1536_v29 = vrot.slane %v1528_v10, %v3225_v11  ;;  %v1543_v40 = vrot.slane %v1529_v28, %v3225_v11  ;;  %v968_v15 = vpop.permute.xlu1 %967  ;;  %v1998_v59 = vrot.slane %v1990_v56, %v3225_v11  ;;  %v2005_v53 = vrot.slane %v1991_v25, %v3225_v11  ;;  %v89_v54 = vld [vmem:[#allocation2 + $0xf0] sm:$0xf]  ;;  %s2276_s26 = scalar_lea.vmem %s2207_s25, 16  ;;  %s2280_s27 = scalar_lea.vmem %s2207_s25, 32 }
 0x257   :  { %v1098_v49 = vpop.permute.xlu0 %1097  ;;  %v1229_v20 = vsel %vm1215_vm2, %v1212_v36, %v968_v15  ;;  %v236_v3 = vmul.f32 %v2253_v31, %v3583_v22  ;;  %p2277_p8 = scmp.ne.s32.totalorder %s2207_s25, %s2276_s26  ;;  %p2281_p9 = scmp.lt.s32.totalorder %s2207_s25, %s2207_s25 }
 0x258   :  { %v1544_v33 = vcombine.high %v1536_v29, %v1536_v29  ;;  %v1545_v6 = vcombine.high %v1543_v40, %v1543_v40  ;;  %v2006_v58 = vcombine.low %v1998_v59, %v2005_v53  ;;  %v2007_v27 = vcombine.high %v1998_v59, %v2005_v53  ;;  %p2282_p10 = scmp.lt.s32.totalorder %s2280_s27, %s2276_s26 }
 0x259   :  { %v1712_v16 = vmul.f32 %v1536_v29, %v77_v8  ;;  %v1714_v5 = vmul.f32 %v1543_v40, %v79_v51  ;;  %v1262_v56 = vsel %vm1198_vm1, %v1246_v55, %v1098_v49  ;;  %v1197_v8 = vsel %vm1181_vm0, %v236_v3, %v3585_v38  ;;  %v3586_v29 = vld [vmem:[#allocation46_spill] sm:$0xff] }
 0x25a   :  { %v1713_v34 = vmul.f32 %v1544_v33, %v78_v26  ;;  %v1715_v62 = vmul.f32 %v1545_v6, %v80_v9  ;;  %v1160_v44 = vpop.permute.xlu1 %1159  ;;  %v2145_v63 = vadd.f32 %v2007_v27, %v2006_v58  ;;  %v3587_v9 = vld [vmem:[#allocation45_spill] sm:$0xff]  ;;  %v85_v33 = vld [vmem:[#allocation2 + $0xe0] sm:$0xf]  ;;  %p2283_p11 = por %p2282_p10, %p2281_p9 }
 0x25b   :  { %v1277_v47 = vsel %vm1215_vm2, %v1261_v57, %v1160_v44  ;;  %v1036_v52 = vpop.permute.xlu0 %1035  ;;  %v1214_v49 = vsel %vm1198_vm1, %v1197_v8, %v3587_v9 }
 0x25c   :  { %v2008_v18 = vcombine.low %v1712_v16, %v1713_v34  ;;  %v2009_v42 = vcombine.low %v1714_v5, %v1715_v62  ;;  %v1546_v1 = vcombine.low %v1229_v20, %v1277_v47  ;;  %v1547_v2 = vcombine.high %v1229_v20, %v1277_v47  ;;  %2146 = vadd.xlane.f32.xlu1 %v2145_v63  ;;  %v86_v16 = vld [vmem:[#allocation2 + $0xe4] sm:$0xf]  ;;  %v87_v34 = vld [vmem:[#allocation2 + $0xe8] sm:$0xf]  ;;  %v88_v5 = vld [vmem:[#allocation2 + $0xec] sm:$0xf]  ;;  %p2284_p12 = pnand %p2283_p11, %p2277_p8 }
 0x25d   :  { %v1247_v46 = vsel %vm1181_vm0, %v556_v41, %v1036_v52 }
 0x25e   :  { %v1554_v13 = vrot.slane %v1546_v1, %v3225_v11  ;;  %v1561_v35 = vrot.slane %v1547_v2, %v3225_v11  ;;  %v970_v17 = vpop.permute.xlu1 %969  ;;  %v2016_v43 = vrot.slane %v2008_v18, %v3225_v11  ;;  %v2023_v32 = vrot.slane %v2009_v42, %v3225_v11 }
 0x25f   :  { %v1100_v4 = vpop.permute.xlu0 %1099  ;;  %v1230_v40 = vsel %vm1215_vm2, %v3586_v29, %v970_v17 }
 0x260   :  { %v1562_v30 = vcombine.high %v1554_v13, %v1554_v13  ;;  %v1563_v19 = vcombine.high %v1561_v35, %v1561_v35  ;;  %v2024_v25 = vcombine.low %v2016_v43, %v2023_v32  ;;  %v2025_v10 = vcombine.high %v2016_v43, %v2023_v32  ;;  %v90_v32 = vld [vmem:[#allocation2 + $0xf4] sm:$0xf] }
 0x261   :  { %v1716_v28 = vmul.f32 %v1554_v13, %v81_v39  ;;  %v1718_v60 = vmul.f32 %v1561_v35, %v83_v0  ;;  %v1263_v27 = vsel %vm1198_vm1, %v1247_v46, %v1100_v4  ;;  %v92_v0 = vld [vmem:[#allocation2 + $0xfc] sm:$0xf] }
 0x262   :  { %v1717_v14 = vmul.f32 %v1562_v30, %v82_v48  ;;  %v1719_v12 = vmul.f32 %v1563_v19, %v84_v23  ;;  %v1162_v7 = vpop.permute.xlu1 %1161  ;;  %v2148_v15 = vadd.f32 %v2025_v10, %v2024_v25  ;;  %v91_v48 = vld [vmem:[#allocation2 + $0xf8] sm:$0xf] }
 0x263   :  { %v1278_v50 = vsel %vm1215_vm2, %v1262_v56, %v1162_v7  ;;  %v1164_v61 = vpop.permute.xlu0 %1163 }
 0x264   :  { %v2026_v59 = vcombine.low %v1716_v28, %v1717_v14  ;;  %v2027_v53 = vcombine.low %v1718_v60, %v1719_v12  ;;  %v1564_v26 = vcombine.low %v1230_v40, %v1278_v50  ;;  %v1565_v51 = vcombine.high %v1230_v40, %v1278_v50  ;;  %2149 = vadd.xlane.f32.xlu0 %v2148_v15 }
 0x265   :  { %v1279_v47 = vsel %vm1215_vm2, %v1263_v27, %v1164_v61 }
 0x266   :  { %v1572_v6 = vrot.slane %v1564_v26, %v3225_v11  ;;  %v1579_v24 = vrot.slane %v1565_v51, %v3225_v11  ;;  %v972_v36 = vpop.permute.xlu1 %971  ;;  %v2034_v57 = vrot.slane %v2026_v59, %v3225_v11  ;;  %v2041_v58 = vrot.slane %v2027_v53, %v3225_v11 }
 0x267   :  { %v1231_v62 = vsel %vm1215_vm2, %v1214_v49, %v972_v36 }
 0x268   :  { %v1580_v44 = vcombine.high %v1572_v6, %v1572_v6  ;;  %v1581_v20 = vcombine.high %v1579_v24, %v1579_v24  ;;  %v1582_v52 = vcombine.low %v1231_v62, %v1279_v47  ;;  %v1583_v63 = vcombine.high %v1231_v62, %v1279_v47 }
 0x269   :  { %v2042_v18 = vcombine.low %v2034_v57, %v2041_v58  ;;  %v2043_v42 = vcombine.high %v2034_v57, %v2041_v58  ;;  %v1720_v1 = vmul.f32 %v1572_v6, %v85_v33  ;;  %v1722_v21 = vmul.f32 %v1579_v24, %v87_v34 }
 0x26a   :  { %v1721_v2 = vmul.f32 %v1580_v44, %v86_v16  ;;  %v1723_v45 = vmul.f32 %v1581_v20, %v88_v5  ;;  %v1590_v39 = vrot.slane %v1582_v52, %v3225_v11  ;;  %v1597_v13 = vrot.slane %v1583_v63, %v3225_v11 }
 0x26b   :  { %v2151_v35 = vadd.f32 %v2043_v42, %v2042_v18  ;;  %v3588_v6 = vlaneseq }
 0x26c   :  { %v2044_v17 = vcombine.low %v1720_v1, %v1721_v2  ;;  %v2045_v43 = vcombine.low %v1722_v21, %v1723_v45  ;;  %v1598_v23 = vcombine.high %v1590_v39, %v1590_v39  ;;  %v1599_v4 = vcombine.high %v1597_v13, %v1597_v13 }
 0x26d   :  { %2152 = vadd.xlane.f32.xlu1 %v2151_v35  ;;  %v1724_v3 = vmul.f32 %v1590_v39, %v89_v54  ;;  %v1726_v30 = vmul.f32 %v1597_v13, %v91_v48  ;;  %v2193_v24 = vand.u32 127, %v3588_v6 }
 0x26e   :  { %v2052_v31 = vrot.slane %v2044_v17, %v3225_v11  ;;  %v2059_v22 = vrot.slane %v2045_v43, %v3225_v11  ;;  %v1725_v55 = vmul.f32 %v1598_v23, %v90_v32  ;;  %v1727_v19 = vmul.f32 %v1599_v4, %v92_v0 }
 0x26f   :  { %vm2197_vm3 = vcmp.lt.s32.totalorder %v2193_v24, 2 }
 0x270   :  { %v2060_v37 = vcombine.low %v2052_v31, %v2059_v22  ;;  %v2061_v41 = vcombine.high %v2052_v31, %v2059_v22  ;;  %v2062_v56 = vcombine.low %v1724_v3, %v1725_v55  ;;  %v2063_v25 = vcombine.low %v1726_v30, %v1727_v19 }
 0x272   :  { %v2154_v10 = vadd.f32 %v2061_v41, %v2060_v37  ;;  %v2070_v28 = vrot.slane %v2062_v56, %v3225_v11  ;;  %v2077_v14 = vrot.slane %v2063_v25, %v3225_v11 }
 0x274   :  { %2155 = vadd.xlane.f32.xlu0 %v2154_v10  ;;  %v2078_v60 = vcombine.low %v2070_v28, %v2077_v14  ;;  %v2079_v12 = vcombine.high %v2070_v28, %v2077_v14 }
 0x276   :  { %v2157_v7 = vadd.f32 %v2079_v12, %v2078_v60 }
 0x278   :  { %2158 = vadd.xlane.f32.xlu1 %v2157_v7 }
 0x2a2   :  { %v2114_v38 = vpop.xlane.xlu1 %2113  ;;  %v2117_v8 = vpop.xlane.xlu0 %2116 }
 0x2a3   :  { %2160 = vxpose.xlu0.b32.start [1/16] (narrow) %v2114_v38, 8 }
 0x2a6   :  { %v2120_v29 = vpop.xlane.xlu0 %2119 }
 0x2a7   :  { %2161 = vxpose.xlu0.b32.cont [2/16] (narrow) %v2117_v8, 8 }
 0x2ab   :  { %2162 = vxpose.xlu0.b32.cont [3/16] (narrow) %v2120_v29, 8 }
 0x2ad   :  { %v2123_v40 = vpop.xlane.xlu1 %2122 }
 0x2ae   :  { %v2126_v50 = vpop.xlane.xlu0 %2125 }
 0x2af   :  { %2163 = vxpose.xlu0.b32.cont [4/16] (narrow) %v2123_v40, 8 }
 0x2b3   :  { %2164 = vxpose.xlu0.b32.cont [5/16] (narrow) %v2126_v50, 8 }
 0x2b9   :  { %v2129_v15 = vpop.xlane.xlu1 %2128 }
 0x2ba   :  { %2165 = vxpose.xlu0.b32.cont [6/16] (narrow) %v2129_v15, 8 }
 0x2c1   :  { %v2132_v59 = vpop.xlane.xlu0 %2131 }
 0x2c2   :  { %2166 = vxpose.xlu0.b32.cont [7/16] (narrow) %v2132_v59, 8 }
 0x2c9   :  { %v2135_v11 = vpop.xlane.xlu1 %2134 }
 0x2ca   :  { %2167 = vxpose.xlu0.b32.cont [8/16] (narrow) %v2135_v11, 8 }
 0x2d1   :  { %v2138_v53 = vpop.xlane.xlu0 %2137 }
 0x2d2   :  { %2168 = vxpose.xlu0.b32.cont [9/16] (narrow) %v2138_v53, 8 }
 0x2d9   :  { %v2141_v26 = vpop.xlane.xlu1 %2140 }
 0x2da   :  { %2169 = vxpose.xlu0.b32.cont [10/16] (narrow) %v2141_v26, 8 }
 0x2e1   :  { %v2144_v51 = vpop.xlane.xlu0 %2143 }
 0x2e2   :  { %2170 = vxpose.xlu0.b32.cont [11/16] (narrow) %v2144_v51, 8 }
 0x2e9   :  { %v2147_v9 = vpop.xlane.xlu1 %2146 }
 0x2ea   :  { %2171 = vxpose.xlu0.b32.cont [12/16] (narrow) %v2147_v9, 8 }
 0x2f1   :  { %v2150_v49 = vpop.xlane.xlu0 %2149 }
 0x2f2   :  { %2172 = vxpose.xlu0.b32.cont [13/16] (narrow) %v2150_v49, 8 }
 0x2fa   :  { %v2153_v46 = vpop.xlane.xlu1 %2152 }
 0x2fb   :  { %2173 = vxpose.xlu0.b32.cont [14/16] (narrow) %v2153_v46, 8 }
 0x301   :  { %v2156_v61 = vpop.xlane.xlu0 %2155 }
 0x302   :  { %2174 = vxpose.xlu0.b32.cont [15/16] (narrow) %v2156_v61, 8 }
 0x305   :  { %v2159_v33 = vpop.xlane.xlu1 %2158 }
 0x306   :  { %2175 = vxpose.xlu0.b32.end [16/16] (narrow) %v2159_v33, 8 }
 0x34a   :  { %v2176_v36 = vpop.trf.xlu0 }
 0x34b   :  { %v2198_v57 = vsel %vm2197_vm3, %v2176_v36, 0.0 }
 0x34c   :  { %2199 = vst [vmem:[#allocation5] sm:$0x1] %v2198_v57 }
 0x34d   :  { %2287 = shalt.err (!%p2284_p12)
}
 0x34e   :  { %s2288_s30 = scalar_lea.hbm %s3504_s3, 16 }
 0x34f   :  { %p2289_p13 = scmp.ne.s32.totalorder %s3504_s3, %s2288_s30  ;;  %p2292_p0 = scmp.lt.u32.totalorder %s2288_s30, %s3504_s3 }
 0x351   :  { %p2294_p1 = pnand %p2292_p0, %p2289_p13 }
 0x353   :  { %2297 = shalt.err (!%p2294_p1)
}
 0x354   :  { %2209 = dma.vmem_to_hbm [thread:$0]  %s2207_s25, 16, %s3504_s3, [#allocation4]  }
 0x355   :  { %2300 = dma.done.wait [#allocation4], 16  }
 0x356   :  { %2301 = vsyncadd [#allocation4], 4294967280 }
 0x357   :  { %2213 = vsyncpa [#allocation3], 1 }
 0x358   :  { %2214 = vsyncpa [#allocation4], 1 }

</bundles_post_ra>
